<compile_context>
chip_gen: v5e
topology: v5e:2x2
jax: 0.10.0
libtpu: 0.0.40
codegen_flags: <defaults>
</compile_context>

<pallas_src>
import jax
import jax.numpy as jnp
from jax.experimental import pallas as pl
from jax.experimental.pallas import tpu as pltpu

# ----------------------------- hyper-params ---------------------------------
INPUT_DIM = 12      # vocab size of pretrained embedding_matrix_de
EMB_DIM = 16
HID_DIM = 32
N_LAYERS = 2
BATCH = 2
SRC_LEN = 7
PAD_IDX = 0

B_PAD = 8                 # pad batch to one f32 sublane group
GATES = 4 * HID_DIM       # 128 -> lane-dense gate tile


# ------------------------------ Pallas kernel --------------------------------
def _make_encoder_kernel(seq_len):
    def kernel(x_ref, wih_ref, whh_ref, b_ref, h_out_ref, c_out_ref):
        """Whole sequence through all LSTM layers in one invocation.

        x_ref   : [seq_len, B_PAD, HID_DIM]  (embedding zero-padded to HID_DIM)
        wih_ref : [N_LAYERS, HID_DIM, GATES] (layer-0 rows zero-padded EMB->HID)
        whh_ref : [N_LAYERS, HID_DIM, GATES]
        b_ref   : [N_LAYERS, 1, GATES]       (combined b_ih + b_hh)
        PyTorch gate order: i, f, g, o.
        """
        # Load weights / bias ONCE (hoisted out of the unrolled loops).
        wih = [wih_ref[l] for l in range(N_LAYERS)]
        whh = [whh_ref[l] for l in range(N_LAYERS)]
        bias = [b_ref[l] for l in range(N_LAYERS)]          # [1, GATES]

        # vreg-resident state, carried through the unrolled loop as values.
        h = [jnp.zeros((B_PAD, HID_DIM), jnp.float32) for _ in range(N_LAYERS)]
        c = [jnp.zeros((B_PAD, HID_DIM), jnp.float32) for _ in range(N_LAYERS)]

        def sigmoid(z):
            # single tanh EUP push instead of exp + reciprocal
            return 0.5 * jnp.tanh(0.5 * z) + 0.5

        for t in range(seq_len):                             # fully unrolled
            x = x_ref[t]                                     # [B_PAD, HID_DIM]
            for l in range(N_LAYERS):                        # fully unrolled
                gates = (jnp.dot(x, wih[l], preferred_element_type=jnp.float32)
                         + jnp.dot(h[l], whh[l], preferred_element_type=jnp.float32)
                         + bias[l])                          # [B_PAD, GATES]
                sig = sigmoid(gates)                         # one EUP pass
                tnh = jnp.tanh(gates)                        # one EUP pass
                i = sig[:, 0 * HID_DIM:1 * HID_DIM]
                f = sig[:, 1 * HID_DIM:2 * HID_DIM]
                g = tnh[:, 2 * HID_DIM:3 * HID_DIM]
                o = sig[:, 3 * HID_DIM:4 * HID_DIM]
                c_new = f * c[l] + i * g
                h_new = o * jnp.tanh(c_new)
                c[l] = c_new
                h[l] = h_new
                x = h_new

        # Single writeback at the end.
        for l in range(N_LAYERS):
            h_out_ref[l] = h[l]
            c_out_ref[l] = c[l]

    return kernel


def make_encoder_call(seq_len):
    vmem = pl.BlockSpec(memory_space=pltpu.MemorySpace.VMEM)
    return pl.pallas_call(
        _make_encoder_kernel(seq_len),
        out_shape=(jax.ShapeDtypeStruct((N_LAYERS, B_PAD, HID_DIM), jnp.float32),
                   jax.ShapeDtypeStruct((N_LAYERS, B_PAD, HID_DIM), jnp.float32)),
        in_specs=[vmem, vmem, vmem, vmem],   # whole arrays resident in VMEM (<0.1 MiB)
        out_specs=(vmem, vmem),
    )


ENCODER_CALL = make_encoder_call(SRC_LEN)


# ------------------------------ parameters -----------------------------------
def init_params(key):
    def norm(k, shape, scale=0.1):
        return (scale * jax.random.normal(k, shape)).astype(jnp.float32)

    keys = iter(jax.random.split(key, 1 + 3 * N_LAYERS))
    emb = norm(next(keys), (INPUT_DIM, EMB_DIM))
    emb = emb.at[PAD_IDX].set(0.0)   # nn.Embedding padding_idx row is zero

    wih_layers, whh_layers, b_layers = [], [], []
    for l in range(N_LAYERS):
        in_dim = EMB_DIM if l == 0 else HID_DIM
        w_ih = norm(next(keys), (in_dim, GATES))
        w_hh = norm(next(keys), (HID_DIM, GATES))
        b = norm(next(keys), (GATES,))                       # combined b_ih + b_hh
        # zero-pad layer-0 W_ih rows to HID so every layer shares K = HID
        w_ih_pad = jnp.zeros((HID_DIM, GATES), jnp.float32).at[:in_dim].set(w_ih)
        wih_layers.append(w_ih_pad)
        whh_layers.append(w_hh)
        b_layers.append(b.reshape(1, GATES))
    return (emb, jnp.stack(wih_layers), jnp.stack(whh_layers), jnp.stack(b_layers))


# ------------------------------ model forward --------------------------------
@jax.jit
def encoder_forward(emb_matrix, wih, whh, b, src):
    # TODO(synk): dropout on embedded inputs / between LSTM layers omitted (eval-mode identity).
    emb = jnp.take(emb_matrix, src, axis=0)                          # [S, B, E]
    emb = jnp.pad(emb, ((0, 0), (0, B_PAD - BATCH), (0, HID_DIM - EMB_DIM)))
    h_pad, c_pad = ENCODER_CALL(emb, wih, whh, b)
    return h_pad[:, :BATCH, :], c_pad[:, :BATCH, :]                  # [L, B, H] each


def encoder_reference(emb_matrix, wih, whh, b, src):
    """Pure-JAX reference (same math, no Pallas) for verification."""
    emb = jnp.take(emb_matrix, src, axis=0)
    emb = jnp.pad(emb, ((0, 0), (0, 0), (0, HID_DIM - EMB_DIM)))
    h = [jnp.zeros((BATCH, HID_DIM), jnp.float32) for _ in range(N_LAYERS)]
    c = [jnp.zeros((BATCH, HID_DIM), jnp.float32) for _ in range(N_LAYERS)]
    for t in range(src.shape[0]):
        x = emb[t]
        for l in range(N_LAYERS):
            gates = x @ wih[l] + h[l] @ whh[l] + b[l]
            i = jax.nn.sigmoid(gates[:, :HID_DIM])
            f = jax.nn.sigmoid(gates[:, HID_DIM:2 * HID_DIM])
            g = jnp.tanh(gates[:, 2 * HID_DIM:3 * HID_DIM])
            o = jax.nn.sigmoid(gates[:, 3 * HID_DIM:])
            c[l] = f * c[l] + i * g
            h[l] = o * jnp.tanh(c[l])
            x = h[l]
    return jnp.stack(h), jnp.stack(c)


# ----------------------------------- main ------------------------------------
if __name__ == "__main__":
    key = jax.random.PRNGKey(0)
    pk, sk = jax.random.split(key)
    emb_matrix, wih, whh, b = init_params(pk)
    src = jax.random.randint(sk, (SRC_LEN, BATCH), 0, INPUT_DIM, dtype=jnp.int32)

    hidden, cell = encoder_forward(emb_matrix, wih, whh, b, src)
    jax.block_until_ready((hidden, cell))
    assert hidden.shape == (N_LAYERS, BATCH, HID_DIM)
    assert cell.shape == (N_LAYERS, BATCH, HID_DIM)

    h_ref, c_ref = encoder_reference(emb_matrix, wih, whh, b, src)
    err = max(float(jnp.max(jnp.abs(hidden - h_ref))),
              float(jnp.max(jnp.abs(cell - c_ref))))
    assert err < 1e-3, f"mismatch vs pure-JAX reference: {err}"
    print("KERNEL_OK")
</pallas_src>

<mosaic_0001>
module attributes {stable_mosaic.version = 11 : i64} {
  func.func @kernel(%arg0: memref<7x8x32xf32, #tpu.memory_space<vmem>>, %arg1: memref<2x32x128xf32, #tpu.memory_space<vmem>>, %arg2: memref<2x32x128xf32, #tpu.memory_space<vmem>>, %arg3: memref<2x1x128xf32, #tpu.memory_space<vmem>>, %arg4: memref<2x8x32xf32, #tpu.memory_space<vmem>>, %arg5: memref<2x8x32xf32, #tpu.memory_space<vmem>>) attributes {dimension_semantics = [], scalar_prefetch = 0 : i64, scratch_operands = 0 : i64, tpu.core_type = #tpu.core_type<tc>} {
    %c0 = arith.constant 0 : index
    %c0_0 = arith.constant 0 : index
    %c0_1 = arith.constant 0 : index
    %0 = vector.load %arg1[%c0, %c0_0, %c0_1] : memref<2x32x128xf32, #tpu.memory_space<vmem>>, vector<1x32x128xf32>
    %1 = vector.shape_cast %0 : vector<1x32x128xf32> to vector<32x128xf32>
    %c1 = arith.constant 1 : index
    %c0_2 = arith.constant 0 : index
    %c0_3 = arith.constant 0 : index
    %2 = vector.load %arg1[%c1, %c0_2, %c0_3] : memref<2x32x128xf32, #tpu.memory_space<vmem>>, vector<1x32x128xf32>
    %3 = vector.shape_cast %2 : vector<1x32x128xf32> to vector<32x128xf32>
    %c0_4 = arith.constant 0 : index
    %c0_5 = arith.constant 0 : index
    %c0_6 = arith.constant 0 : index
    %4 = vector.load %arg2[%c0_4, %c0_5, %c0_6] : memref<2x32x128xf32, #tpu.memory_space<vmem>>, vector<1x32x128xf32>
    %5 = vector.shape_cast %4 : vector<1x32x128xf32> to vector<32x128xf32>
    %c1_7 = arith.constant 1 : index
    %c0_8 = arith.constant 0 : index
    %c0_9 = arith.constant 0 : index
    %6 = vector.load %arg2[%c1_7, %c0_8, %c0_9] : memref<2x32x128xf32, #tpu.memory_space<vmem>>, vector<1x32x128xf32>
    %7 = vector.shape_cast %6 : vector<1x32x128xf32> to vector<32x128xf32>
    %c0_10 = arith.constant 0 : index
    %c0_11 = arith.constant 0 : index
    %c0_12 = arith.constant 0 : index
    %8 = vector.load %arg3[%c0_10, %c0_11, %c0_12] : memref<2x1x128xf32, #tpu.memory_space<vmem>>, vector<1x1x128xf32>
    %9 = vector.shape_cast %8 : vector<1x1x128xf32> to vector<1x128xf32>
    %c1_13 = arith.constant 1 : index
    %c0_14 = arith.constant 0 : index
    %c0_15 = arith.constant 0 : index
    %10 = vector.load %arg3[%c1_13, %c0_14, %c0_15] : memref<2x1x128xf32, #tpu.memory_space<vmem>>, vector<1x1x128xf32>
    %11 = vector.shape_cast %10 : vector<1x1x128xf32> to vector<1x128xf32>
    %cst = arith.constant 0.000000e+00 : f32
    %12 = vector.broadcast %cst : f32 to vector<8x32xf32>
    %cst_16 = arith.constant 0.000000e+00 : f32
    %13 = vector.broadcast %cst_16 : f32 to vector<8x32xf32>
    %cst_17 = arith.constant 0.000000e+00 : f32
    %14 = vector.broadcast %cst_17 : f32 to vector<8x32xf32>
    %cst_18 = arith.constant 0.000000e+00 : f32
    %15 = vector.broadcast %cst_18 : f32 to vector<8x32xf32>
    %c0_19 = arith.constant 0 : index
    %c0_20 = arith.constant 0 : index
    %c0_21 = arith.constant 0 : index
    %16 = vector.load %arg0[%c0_19, %c0_20, %c0_21] : memref<7x8x32xf32, #tpu.memory_space<vmem>>, vector<1x8x32xf32>
    %17 = vector.shape_cast %16 : vector<1x8x32xf32> to vector<8x32xf32>
    %cst_22 = arith.constant dense<0.000000e+00> : vector<8x128xf32>
    %18 = tpu.matmul %17, %1, %cst_22 {dimension_numbers = #tpu.dot_dimension_numbers<[1], [0], [0], [1], [0, 0, 1, 1], [], []>} : vector<8x32xf32>, vector<32x128xf32>, vector<8x128xf32> -> vector<8x128xf32>
    %cst_23 = arith.constant dense<0.000000e+00> : vector<8x128xf32>
    %19 = tpu.matmul %12, %5, %cst_23 {dimension_numbers = #tpu.dot_dimension_numbers<[1], [0], [0], [1], [0, 0, 1, 1], [], []>} : vector<8x32xf32>, vector<32x128xf32>, vector<8x128xf32> -> vector<8x128xf32>
    %20 = arith.addf %18, %19 : vector<8x128xf32>
    %21 = vector.broadcast %9 : vector<1x128xf32> to vector<8x128xf32>
    %22 = arith.addf %20, %21 : vector<8x128xf32>
    %cst_24 = arith.constant 5.000000e-01 : f32
    %23 = vector.broadcast %cst_24 : f32 to vector<8x128xf32>
    %24 = arith.mulf %23, %22 : vector<8x128xf32>
    %25 = math.tanh %24 : vector<8x128xf32>
    %cst_25 = arith.constant 5.000000e-01 : f32
    %26 = vector.broadcast %cst_25 : f32 to vector<8x128xf32>
    %27 = arith.mulf %26, %25 : vector<8x128xf32>
    %cst_26 = arith.constant 5.000000e-01 : f32
    %28 = vector.broadcast %cst_26 : f32 to vector<8x128xf32>
    %29 = arith.addf %27, %28 : vector<8x128xf32>
    %30 = math.tanh %22 : vector<8x128xf32>
    %31 = vector.extract_strided_slice %29 {offsets = [0, 0], sizes = [8, 32], strides = [1, 1]} : vector<8x128xf32> to vector<8x32xf32>
    %32 = vector.extract_strided_slice %29 {offsets = [0, 32], sizes = [8, 32], strides = [1, 1]} : vector<8x128xf32> to vector<8x32xf32>
    %33 = vector.extract_strided_slice %30 {offsets = [0, 64], sizes = [8, 32], strides = [1, 1]} : vector<8x128xf32> to vector<8x32xf32>
    %34 = vector.extract_strided_slice %29 {offsets = [0, 96], sizes = [8, 32], strides = [1, 1]} : vector<8x128xf32> to vector<8x32xf32>
    %35 = arith.mulf %32, %14 : vector<8x32xf32>
    %36 = arith.mulf %31, %33 : vector<8x32xf32>
    %37 = arith.addf %35, %36 : vector<8x32xf32>
    %38 = math.tanh %37 : vector<8x32xf32>
    %39 = arith.mulf %34, %38 : vector<8x32xf32>
    %cst_27 = arith.constant dense<0.000000e+00> : vector<8x128xf32>
    %40 = tpu.matmul %39, %3, %cst_27 {dimension_numbers = #tpu.dot_dimension_numbers<[1], [0], [0], [1], [0, 0, 1, 1], [], []>} : vector<8x32xf32>, vector<32x128xf32>, vector<8x128xf32> -> vector<8x128xf32>
    %cst_28 = arith.constant dense<0.000000e+00> : vector<8x128xf32>
    %41 = tpu.matmul %13, %7, %cst_28 {dimension_numbers = #tpu.dot_dimension_numbers<[1], [0], [0], [1], [0, 0, 1, 1], [], []>} : vector<8x32xf32>, vector<32x128xf32>, vector<8x128xf32> -> vector<8x128xf32>
    %42 = arith.addf %40, %41 : vector<8x128xf32>
    %43 = vector.broadcast %11 : vector<1x128xf32> to vector<8x128xf32>
    %44 = arith.addf %42, %43 : vector<8x128xf32>
    %cst_29 = arith.constant 5.000000e-01 : f32
    %45 = vector.broadcast %cst_29 : f32 to vector<8x128xf32>
    %46 = arith.mulf %45, %44 : vector<8x128xf32>
    %47 = math.tanh %46 : vector<8x128xf32>
    %cst_30 = arith.constant 5.000000e-01 : f32
    %48 = vector.broadcast %cst_30 : f32 to vector<8x128xf32>
    %49 = arith.mulf %48, %47 : vector<8x128xf32>
    %cst_31 = arith.constant 5.000000e-01 : f32
    %50 = vector.broadcast %cst_31 : f32 to vector<8x128xf32>
    %51 = arith.addf %49, %50 : vector<8x128xf32>
    %52 = math.tanh %44 : vector<8x128xf32>
    %53 = vector.extract_strided_slice %51 {offsets = [0, 0], sizes = [8, 32], strides = [1, 1]} : vector<8x128xf32> to vector<8x32xf32>
    %54 = vector.extract_strided_slice %51 {offsets = [0, 32], sizes = [8, 32], strides = [1, 1]} : vector<8x128xf32> to vector<8x32xf32>
    %55 = vector.extract_strided_slice %52 {offsets = [0, 64], sizes = [8, 32], strides = [1, 1]} : vector<8x128xf32> to vector<8x32xf32>
    %56 = vector.extract_strided_slice %51 {offsets = [0, 96], sizes = [8, 32], strides = [1, 1]} : vector<8x128xf32> to vector<8x32xf32>
    %57 = arith.mulf %54, %15 : vector<8x32xf32>
    %58 = arith.mulf %53, %55 : vector<8x32xf32>
    %59 = arith.addf %57, %58 : vector<8x32xf32>
    %60 = math.tanh %59 : vector<8x32xf32>
    %61 = arith.mulf %56, %60 : vector<8x32xf32>
    %c1_32 = arith.constant 1 : index
    %c0_33 = arith.constant 0 : index
    %c0_34 = arith.constant 0 : index
    %62 = vector.load %arg0[%c1_32, %c0_33, %c0_34] : memref<7x8x32xf32, #tpu.memory_space<vmem>>, vector<1x8x32xf32>
    %63 = vector.shape_cast %62 : vector<1x8x32xf32> to vector<8x32xf32>
    %cst_35 = arith.constant dense<0.000000e+00> : vector<8x128xf32>
    %64 = tpu.matmul %63, %1, %cst_35 {dimension_numbers = #tpu.dot_dimension_numbers<[1], [0], [0], [1], [0, 0, 1, 1], [], []>} : vector<8x32xf32>, vector<32x128xf32>, vector<8x128xf32> -> vector<8x128xf32>
    %cst_36 = arith.constant dense<0.000000e+00> : vector<8x128xf32>
    %65 = tpu.matmul %39, %5, %cst_36 {dimension_numbers = #tpu.dot_dimension_numbers<[1], [0], [0], [1], [0, 0, 1, 1], [], []>} : vector<8x32xf32>, vector<32x128xf32>, vector<8x128xf32> -> vector<8x128xf32>
    %66 = arith.addf %64, %65 : vector<8x128xf32>
    %67 = vector.broadcast %9 : vector<1x128xf32> to vector<8x128xf32>
    %68 = arith.addf %66, %67 : vector<8x128xf32>
    %cst_37 = arith.constant 5.000000e-01 : f32
    %69 = vector.broadcast %cst_37 : f32 to vector<8x128xf32>
    %70 = arith.mulf %69, %68 : vector<8x128xf32>
    %71 = math.tanh %70 : vector<8x128xf32>
    %cst_38 = arith.constant 5.000000e-01 : f32
    %72 = vector.broadcast %cst_38 : f32 to vector<8x128xf32>
    %73 = arith.mulf %72, %71 : vector<8x128xf32>
    %cst_39 = arith.constant 5.000000e-01 : f32
    %74 = vector.broadcast %cst_39 : f32 to vector<8x128xf32>
    %75 = arith.addf %73, %74 : vector<8x128xf32>
    %76 = math.tanh %68 : vector<8x128xf32>
    %77 = vector.extract_strided_slice %75 {offsets = [0, 0], sizes = [8, 32], strides = [1, 1]} : vector<8x128xf32> to vector<8x32xf32>
    %78 = vector.extract_strided_slice %75 {offsets = [0, 32], sizes = [8, 32], strides = [1, 1]} : vector<8x128xf32> to vector<8x32xf32>
    %79 = vector.extract_strided_slice %76 {offsets = [0, 64], sizes = [8, 32], strides = [1, 1]} : vector<8x128xf32> to vector<8x32xf32>
    %80 = vector.extract_strided_slice %75 {offsets = [0, 96], sizes = [8, 32], strides = [1, 1]} : vector<8x128xf32> to vector<8x32xf32>
    %81 = arith.mulf %78, %37 : vector<8x32xf32>
    %82 = arith.mulf %77, %79 : vector<8x32xf32>
    %83 = arith.addf %81, %82 : vector<8x32xf32>
    %84 = math.tanh %83 : vector<8x32xf32>
    %85 = arith.mulf %80, %84 : vector<8x32xf32>
    %cst_40 = arith.constant dense<0.000000e+00> : vector<8x128xf32>
    %86 = tpu.matmul %85, %3, %cst_40 {dimension_numbers = #tpu.dot_dimension_numbers<[1], [0], [0], [1], [0, 0, 1, 1], [], []>} : vector<8x32xf32>, vector<32x128xf32>, vector<8x128xf32> -> vector<8x128xf32>
    %cst_41 = arith.constant dense<0.000000e+00> : vector<8x128xf32>
    %87 = tpu.matmul %61, %7, %cst_41 {dimension_numbers = #tpu.dot_dimension_numbers<[1], [0], [0], [1], [0, 0, 1, 1], [], []>} : vector<8x32xf32>, vector<32x128xf32>, vector<8x128xf32> -> vector<8x128xf32>
    %88 = arith.addf %86, %87 : vector<8x128xf32>
    %89 = vector.broadcast %11 : vector<1x128xf32> to vector<8x128xf32>
    %90 = arith.addf %88, %89 : vector<8x128xf32>
    %cst_42 = arith.constant 5.000000e-01 : f32
    %91 = vector.broadcast %cst_42 : f32 to vector<8x128xf32>
    %92 = arith.mulf %91, %90 : vector<8x128xf32>
    %93 = math.tanh %92 : vector<8x128xf32>
    %cst_43 = arith.constant 5.000000e-01 : f32
    %94 = vector.broadcast %cst_43 : f32 to vector<8x128xf32>
    %95 = arith.mulf %94, %93 : vector<8x128xf32>
    %cst_44 = arith.constant 5.000000e-01 : f32
    %96 = vector.broadcast %cst_44 : f32 to vector<8x128xf32>
    %97 = arith.addf %95, %96 : vector<8x128xf32>
    %98 = math.tanh %90 : vector<8x128xf32>
    %99 = vector.extract_strided_slice %97 {offsets = [0, 0], sizes = [8, 32], strides = [1, 1]} : vector<8x128xf32> to vector<8x32xf32>
    %100 = vector.extract_strided_slice %97 {offsets = [0, 32], sizes = [8, 32], strides = [1, 1]} : vector<8x128xf32> to vector<8x32xf32>
    %101 = vector.extract_strided_slice %98 {offsets = [0, 64], sizes = [8, 32], strides = [1, 1]} : vector<8x128xf32> to vector<8x32xf32>
    %102 = vector.extract_strided_slice %97 {offsets = [0, 96], sizes = [8, 32], strides = [1, 1]} : vector<8x128xf32> to vector<8x32xf32>
    %103 = arith.mulf %100, %59 : vector<8x32xf32>
    %104 = arith.mulf %99, %101 : vector<8x32xf32>
    %105 = arith.addf %103, %104 : vector<8x32xf32>
    %106 = math.tanh %105 : vector<8x32xf32>
    %107 = arith.mulf %102, %106 : vector<8x32xf32>
    %c2 = arith.constant 2 : index
    %c0_45 = arith.constant 0 : index
    %c0_46 = arith.constant 0 : index
    %108 = vector.load %arg0[%c2, %c0_45, %c0_46] : memref<7x8x32xf32, #tpu.memory_space<vmem>>, vector<1x8x32xf32>
    %109 = vector.shape_cast %108 : vector<1x8x32xf32> to vector<8x32xf32>
    %cst_47 = arith.constant dense<0.000000e+00> : vector<8x128xf32>
    %110 = tpu.matmul %109, %1, %cst_47 {dimension_numbers = #tpu.dot_dimension_numbers<[1], [0], [0], [1], [0, 0, 1, 1], [], []>} : vector<8x32xf32>, vector<32x128xf32>, vector<8x128xf32> -> vector<8x128xf32>
    %cst_48 = arith.constant dense<0.000000e+00> : vector<8x128xf32>
    %111 = tpu.matmul %85, %5, %cst_48 {dimension_numbers = #tpu.dot_dimension_numbers<[1], [0], [0], [1], [0, 0, 1, 1], [], []>} : vector<8x32xf32>, vector<32x128xf32>, vector<8x128xf32> -> vector<8x128xf32>
    %112 = arith.addf %110, %111 : vector<8x128xf32>
    %113 = vector.broadcast %9 : vector<1x128xf32> to vector<8x128xf32>
    %114 = arith.addf %112, %113 : vector<8x128xf32>
    %cst_49 = arith.constant 5.000000e-01 : f32
    %115 = vector.broadcast %cst_49 : f32 to vector<8x128xf32>
    %116 = arith.mulf %115, %114 : vector<8x128xf32>
    %117 = math.tanh %116 : vector<8x128xf32>
    %cst_50 = arith.constant 5.000000e-01 : f32
    %118 = vector.broadcast %cst_50 : f32 to vector<8x128xf32>
    %119 = arith.mulf %118, %117 : vector<8x128xf32>
    %cst_51 = arith.constant 5.000000e-01 : f32
    %120 = vector.broadcast %cst_51 : f32 to vector<8x128xf32>
    %121 = arith.addf %119, %120 : vector<8x128xf32>
    %122 = math.tanh %114 : vector<8x128xf32>
    %123 = vector.extract_strided_slice %121 {offsets = [0, 0], sizes = [8, 32], strides = [1, 1]} : vector<8x128xf32> to vector<8x32xf32>
    %124 = vector.extract_strided_slice %121 {offsets = [0, 32], sizes = [8, 32], strides = [1, 1]} : vector<8x128xf32> to vector<8x32xf32>
    %125 = vector.extract_strided_slice %122 {offsets = [0, 64], sizes = [8, 32], strides = [1, 1]} : vector<8x128xf32> to vector<8x32xf32>
    %126 = vector.extract_strided_slice %121 {offsets = [0, 96], sizes = [8, 32], strides = [1, 1]} : vector<8x128xf32> to vector<8x32xf32>
    %127 = arith.mulf %124, %83 : vector<8x32xf32>
    %128 = arith.mulf %123, %125 : vector<8x32xf32>
    %129 = arith.addf %127, %128 : vector<8x32xf32>
    %130 = math.tanh %129 : vector<8x32xf32>
    %131 = arith.mulf %126, %130 : vector<8x32xf32>
    %cst_52 = arith.constant dense<0.000000e+00> : vector<8x128xf32>
    %132 = tpu.matmul %131, %3, %cst_52 {dimension_numbers = #tpu.dot_dimension_numbers<[1], [0], [0], [1], [0, 0, 1, 1], [], []>} : vector<8x32xf32>, vector<32x128xf32>, vector<8x128xf32> -> vector<8x128xf32>
    %cst_53 = arith.constant dense<0.000000e+00> : vector<8x128xf32>
    %133 = tpu.matmul %107, %7, %cst_53 {dimension_numbers = #tpu.dot_dimension_numbers<[1], [0], [0], [1], [0, 0, 1, 1], [], []>} : vector<8x32xf32>, vector<32x128xf32>, vector<8x128xf32> -> vector<8x128xf32>
    %134 = arith.addf %132, %133 : vector<8x128xf32>
    %135 = vector.broadcast %11 : vector<1x128xf32> to vector<8x128xf32>
    %136 = arith.addf %134, %135 : vector<8x128xf32>
    %cst_54 = arith.constant 5.000000e-01 : f32
    %137 = vector.broadcast %cst_54 : f32 to vector<8x128xf32>
    %138 = arith.mulf %137, %136 : vector<8x128xf32>
    %139 = math.tanh %138 : vector<8x128xf32>
    %cst_55 = arith.constant 5.000000e-01 : f32
    %140 = vector.broadcast %cst_55 : f32 to vector<8x128xf32>
    %141 = arith.mulf %140, %139 : vector<8x128xf32>
    %cst_56 = arith.constant 5.000000e-01 : f32
    %142 = vector.broadcast %cst_56 : f32 to vector<8x128xf32>
    %143 = arith.addf %141, %142 : vector<8x128xf32>
    %144 = math.tanh %136 : vector<8x128xf32>
    %145 = vector.extract_strided_slice %143 {offsets = [0, 0], sizes = [8, 32], strides = [1, 1]} : vector<8x128xf32> to vector<8x32xf32>
    %146 = vector.extract_strided_slice %143 {offsets = [0, 32], sizes = [8, 32], strides = [1, 1]} : vector<8x128xf32> to vector<8x32xf32>
    %147 = vector.extract_strided_slice %144 {offsets = [0, 64], sizes = [8, 32], strides = [1, 1]} : vector<8x128xf32> to vector<8x32xf32>
    %148 = vector.extract_strided_slice %143 {offsets = [0, 96], sizes = [8, 32], strides = [1, 1]} : vector<8x128xf32> to vector<8x32xf32>
    %149 = arith.mulf %146, %105 : vector<8x32xf32>
    %150 = arith.mulf %145, %147 : vector<8x32xf32>
    %151 = arith.addf %149, %150 : vector<8x32xf32>
    %152 = math.tanh %151 : vector<8x32xf32>
    %153 = arith.mulf %148, %152 : vector<8x32xf32>
    %c3 = arith.constant 3 : index
    %c0_57 = arith.constant 0 : index
    %c0_58 = arith.constant 0 : index
    %154 = vector.load %arg0[%c3, %c0_57, %c0_58] : memref<7x8x32xf32, #tpu.memory_space<vmem>>, vector<1x8x32xf32>
    %155 = vector.shape_cast %154 : vector<1x8x32xf32> to vector<8x32xf32>
    %cst_59 = arith.constant dense<0.000000e+00> : vector<8x128xf32>
    %156 = tpu.matmul %155, %1, %cst_59 {dimension_numbers = #tpu.dot_dimension_numbers<[1], [0], [0], [1], [0, 0, 1, 1], [], []>} : vector<8x32xf32>, vector<32x128xf32>, vector<8x128xf32> -> vector<8x128xf32>
    %cst_60 = arith.constant dense<0.000000e+00> : vector<8x128xf32>
    %157 = tpu.matmul %131, %5, %cst_60 {dimension_numbers = #tpu.dot_dimension_numbers<[1], [0], [0], [1], [0, 0, 1, 1], [], []>} : vector<8x32xf32>, vector<32x128xf32>, vector<8x128xf32> -> vector<8x128xf32>
    %158 = arith.addf %156, %157 : vector<8x128xf32>
    %159 = vector.broadcast %9 : vector<1x128xf32> to vector<8x128xf32>
    %160 = arith.addf %158, %159 : vector<8x128xf32>
    %cst_61 = arith.constant 5.000000e-01 : f32
    %161 = vector.broadcast %cst_61 : f32 to vector<8x128xf32>
    %162 = arith.mulf %161, %160 : vector<8x128xf32>
    %163 = math.tanh %162 : vector<8x128xf32>
    %cst_62 = arith.constant 5.000000e-01 : f32
    %164 = vector.broadcast %cst_62 : f32 to vector<8x128xf32>
    %165 = arith.mulf %164, %163 : vector<8x128xf32>
    %cst_63 = arith.constant 5.000000e-01 : f32
    %166 = vector.broadcast %cst_63 : f32 to vector<8x128xf32>
    %167 = arith.addf %165, %166 : vector<8x128xf32>
    %168 = math.tanh %160 : vector<8x128xf32>
    %169 = vector.extract_strided_slice %167 {offsets = [0, 0], sizes = [8, 32], strides = [1, 1]} : vector<8x128xf32> to vector<8x32xf32>
    %170 = vector.extract_strided_slice %167 {offsets = [0, 32], sizes = [8, 32], strides = [1, 1]} : vector<8x128xf32> to vector<8x32xf32>
    %171 = vector.extract_strided_slice %168 {offsets = [0, 64], sizes = [8, 32], strides = [1, 1]} : vector<8x128xf32> to vector<8x32xf32>
    %172 = vector.extract_strided_slice %167 {offsets = [0, 96], sizes = [8, 32], strides = [1, 1]} : vector<8x128xf32> to vector<8x32xf32>
    %173 = arith.mulf %170, %129 : vector<8x32xf32>
    %174 = arith.mulf %169, %171 : vector<8x32xf32>
    %175 = arith.addf %173, %174 : vector<8x32xf32>
    %176 = math.tanh %175 : vector<8x32xf32>
    %177 = arith.mulf %172, %176 : vector<8x32xf32>
    %cst_64 = arith.constant dense<0.000000e+00> : vector<8x128xf32>
    %178 = tpu.matmul %177, %3, %cst_64 {dimension_numbers = #tpu.dot_dimension_numbers<[1], [0], [0], [1], [0, 0, 1, 1], [], []>} : vector<8x32xf32>, vector<32x128xf32>, vector<8x128xf32> -> vector<8x128xf32>
    %cst_65 = arith.constant dense<0.000000e+00> : vector<8x128xf32>
    %179 = tpu.matmul %153, %7, %cst_65 {dimension_numbers = #tpu.dot_dimension_numbers<[1], [0], [0], [1], [0, 0, 1, 1], [], []>} : vector<8x32xf32>, vector<32x128xf32>, vector<8x128xf32> -> vector<8x128xf32>
    %180 = arith.addf %178, %179 : vector<8x128xf32>
    %181 = vector.broadcast %11 : vector<1x128xf32> to vector<8x128xf32>
    %182 = arith.addf %180, %181 : vector<8x128xf32>
    %cst_66 = arith.constant 5.000000e-01 : f32
    %183 = vector.broadcast %cst_66 : f32 to vector<8x128xf32>
    %184 = arith.mulf %183, %182 : vector<8x128xf32>
    %185 = math.tanh %184 : vector<8x128xf32>
    %cst_67 = arith.constant 5.000000e-01 : f32
    %186 = vector.broadcast %cst_67 : f32 to vector<8x128xf32>
    %187 = arith.mulf %186, %185 : vector<8x128xf32>
    %cst_68 = arith.constant 5.000000e-01 : f32
    %188 = vector.broadcast %cst_68 : f32 to vector<8x128xf32>
    %189 = arith.addf %187, %188 : vector<8x128xf32>
    %190 = math.tanh %182 : vector<8x128xf32>
    %191 = vector.extract_strided_slice %189 {offsets = [0, 0], sizes = [8, 32], strides = [1, 1]} : vector<8x128xf32> to vector<8x32xf32>
    %192 = vector.extract_strided_slice %189 {offsets = [0, 32], sizes = [8, 32], strides = [1, 1]} : vector<8x128xf32> to vector<8x32xf32>
    %193 = vector.extract_strided_slice %190 {offsets = [0, 64], sizes = [8, 32], strides = [1, 1]} : vector<8x128xf32> to vector<8x32xf32>
    %194 = vector.extract_strided_slice %189 {offsets = [0, 96], sizes = [8, 32], strides = [1, 1]} : vector<8x128xf32> to vector<8x32xf32>
    %195 = arith.mulf %192, %151 : vector<8x32xf32>
    %196 = arith.mulf %191, %193 : vector<8x32xf32>
    %197 = arith.addf %195, %196 : vector<8x32xf32>
    %198 = math.tanh %197 : vector<8x32xf32>
    %199 = arith.mulf %194, %198 : vector<8x32xf32>
    %c4 = arith.constant 4 : index
    %c0_69 = arith.constant 0 : index
    %c0_70 = arith.constant 0 : index
    %200 = vector.load %arg0[%c4, %c0_69, %c0_70] : memref<7x8x32xf32, #tpu.memory_space<vmem>>, vector<1x8x32xf32>
    %201 = vector.shape_cast %200 : vector<1x8x32xf32> to vector<8x32xf32>
    %cst_71 = arith.constant dense<0.000000e+00> : vector<8x128xf32>
    %202 = tpu.matmul %201, %1, %cst_71 {dimension_numbers = #tpu.dot_dimension_numbers<[1], [0], [0], [1], [0, 0, 1, 1], [], []>} : vector<8x32xf32>, vector<32x128xf32>, vector<8x128xf32> -> vector<8x128xf32>
    %cst_72 = arith.constant dense<0.000000e+00> : vector<8x128xf32>
    %203 = tpu.matmul %177, %5, %cst_72 {dimension_numbers = #tpu.dot_dimension_numbers<[1], [0], [0], [1], [0, 0, 1, 1], [], []>} : vector<8x32xf32>, vector<32x128xf32>, vector<8x128xf32> -> vector<8x128xf32>
    %204 = arith.addf %202, %203 : vector<8x128xf32>
    %205 = vector.broadcast %9 : vector<1x128xf32> to vector<8x128xf32>
    %206 = arith.addf %204, %205 : vector<8x128xf32>
    %cst_73 = arith.constant 5.000000e-01 : f32
    %207 = vector.broadcast %cst_73 : f32 to vector<8x128xf32>
    %208 = arith.mulf %207, %206 : vector<8x128xf32>
    %209 = math.tanh %208 : vector<8x128xf32>
    %cst_74 = arith.constant 5.000000e-01 : f32
    %210 = vector.broadcast %cst_74 : f32 to vector<8x128xf32>
    %211 = arith.mulf %210, %209 : vector<8x128xf32>
    %cst_75 = arith.constant 5.000000e-01 : f32
    %212 = vector.broadcast %cst_75 : f32 to vector<8x128xf32>
    %213 = arith.addf %211, %212 : vector<8x128xf32>
    %214 = math.tanh %206 : vector<8x128xf32>
    %215 = vector.extract_strided_slice %213 {offsets = [0, 0], sizes = [8, 32], strides = [1, 1]} : vector<8x128xf32> to vector<8x32xf32>
    %216 = vector.extract_strided_slice %213 {offsets = [0, 32], sizes = [8, 32], strides = [1, 1]} : vector<8x128xf32> to vector<8x32xf32>
    %217 = vector.extract_strided_slice %214 {offsets = [0, 64], sizes = [8, 32], strides = [1, 1]} : vector<8x128xf32> to vector<8x32xf32>
    %218 = vector.extract_strided_slice %213 {offsets = [0, 96], sizes = [8, 32], strides = [1, 1]} : vector<8x128xf32> to vector<8x32xf32>
    %219 = arith.mulf %216, %175 : vector<8x32xf32>
    %220 = arith.mulf %215, %217 : vector<8x32xf32>
    %221 = arith.addf %219, %220 : vector<8x32xf32>
    %222 = math.tanh %221 : vector<8x32xf32>
    %223 = arith.mulf %218, %222 : vector<8x32xf32>
    %cst_76 = arith.constant dense<0.000000e+00> : vector<8x128xf32>
    %224 = tpu.matmul %223, %3, %cst_76 {dimension_numbers = #tpu.dot_dimension_numbers<[1], [0], [0], [1], [0, 0, 1, 1], [], []>} : vector<8x32xf32>, vector<32x128xf32>, vector<8x128xf32> -> vector<8x128xf32>
    %cst_77 = arith.constant dense<0.000000e+00> : vector<8x128xf32>
    %225 = tpu.matmul %199, %7, %cst_77 {dimension_numbers = #tpu.dot_dimension_numbers<[1], [0], [0], [1], [0, 0, 1, 1], [], []>} : vector<8x32xf32>, vector<32x128xf32>, vector<8x128xf32> -> vector<8x128xf32>
    %226 = arith.addf %224, %225 : vector<8x128xf32>
    %227 = vector.broadcast %11 : vector<1x128xf32> to vector<8x128xf32>
    %228 = arith.addf %226, %227 : vector<8x128xf32>
    %cst_78 = arith.constant 5.000000e-01 : f32
    %229 = vector.broadcast %cst_78 : f32 to vector<8x128xf32>
    %230 = arith.mulf %229, %228 : vector<8x128xf32>
    %231 = math.tanh %230 : vector<8x128xf32>
    %cst_79 = arith.constant 5.000000e-01 : f32
    %232 = vector.broadcast %cst_79 : f32 to vector<8x128xf32>
    %233 = arith.mulf %232, %231 : vector<8x128xf32>
    %cst_80 = arith.constant 5.000000e-01 : f32
    %234 = vector.broadcast %cst_80 : f32 to vector<8x128xf32>
    %235 = arith.addf %233, %234 : vector<8x128xf32>
    %236 = math.tanh %228 : vector<8x128xf32>
    %237 = vector.extract_strided_slice %235 {offsets = [0, 0], sizes = [8, 32], strides = [1, 1]} : vector<8x128xf32> to vector<8x32xf32>
    %238 = vector.extract_strided_slice %235 {offsets = [0, 32], sizes = [8, 32], strides = [1, 1]} : vector<8x128xf32> to vector<8x32xf32>
    %239 = vector.extract_strided_slice %236 {offsets = [0, 64], sizes = [8, 32], strides = [1, 1]} : vector<8x128xf32> to vector<8x32xf32>
    %240 = vector.extract_strided_slice %235 {offsets = [0, 96], sizes = [8, 32], strides = [1, 1]} : vector<8x128xf32> to vector<8x32xf32>
    %241 = arith.mulf %238, %197 : vector<8x32xf32>
    %242 = arith.mulf %237, %239 : vector<8x32xf32>
    %243 = arith.addf %241, %242 : vector<8x32xf32>
    %244 = math.tanh %243 : vector<8x32xf32>
    %245 = arith.mulf %240, %244 : vector<8x32xf32>
    %c5 = arith.constant 5 : index
    %c0_81 = arith.constant 0 : index
    %c0_82 = arith.constant 0 : index
    %246 = vector.load %arg0[%c5, %c0_81, %c0_82] : memref<7x8x32xf32, #tpu.memory_space<vmem>>, vector<1x8x32xf32>
    %247 = vector.shape_cast %246 : vector<1x8x32xf32> to vector<8x32xf32>
    %cst_83 = arith.constant dense<0.000000e+00> : vector<8x128xf32>
    %248 = tpu.matmul %247, %1, %cst_83 {dimension_numbers = #tpu.dot_dimension_numbers<[1], [0], [0], [1], [0, 0, 1, 1], [], []>} : vector<8x32xf32>, vector<32x128xf32>, vector<8x128xf32> -> vector<8x128xf32>
    %cst_84 = arith.constant dense<0.000000e+00> : vector<8x128xf32>
    %249 = tpu.matmul %223, %5, %cst_84 {dimension_numbers = #tpu.dot_dimension_numbers<[1], [0], [0], [1], [0, 0, 1, 1], [], []>} : vector<8x32xf32>, vector<32x128xf32>, vector<8x128xf32> -> vector<8x128xf32>
    %250 = arith.addf %248, %249 : vector<8x128xf32>
    %251 = vector.broadcast %9 : vector<1x128xf32> to vector<8x128xf32>
    %252 = arith.addf %250, %251 : vector<8x128xf32>
    %cst_85 = arith.constant 5.000000e-01 : f32
    %253 = vector.broadcast %cst_85 : f32 to vector<8x128xf32>
    %254 = arith.mulf %253, %252 : vector<8x128xf32>
    %255 = math.tanh %254 : vector<8x128xf32>
    %cst_86 = arith.constant 5.000000e-01 : f32
    %256 = vector.broadcast %cst_86 : f32 to vector<8x128xf32>
    %257 = arith.mulf %256, %255 : vector<8x128xf32>
    %cst_87 = arith.constant 5.000000e-01 : f32
    %258 = vector.broadcast %cst_87 : f32 to vector<8x128xf32>
    %259 = arith.addf %257, %258 : vector<8x128xf32>
    %260 = math.tanh %252 : vector<8x128xf32>
    %261 = vector.extract_strided_slice %259 {offsets = [0, 0], sizes = [8, 32], strides = [1, 1]} : vector<8x128xf32> to vector<8x32xf32>
    %262 = vector.extract_strided_slice %259 {offsets = [0, 32], sizes = [8, 32], strides = [1, 1]} : vector<8x128xf32> to vector<8x32xf32>
    %263 = vector.extract_strided_slice %260 {offsets = [0, 64], sizes = [8, 32], strides = [1, 1]} : vector<8x128xf32> to vector<8x32xf32>
    %264 = vector.extract_strided_slice %259 {offsets = [0, 96], sizes = [8, 32], strides = [1, 1]} : vector<8x128xf32> to vector<8x32xf32>
    %265 = arith.mulf %262, %221 : vector<8x32xf32>
    %266 = arith.mulf %261, %263 : vector<8x32xf32>
    %267 = arith.addf %265, %266 : vector<8x32xf32>
    %268 = math.tanh %267 : vector<8x32xf32>
    %269 = arith.mulf %264, %268 : vector<8x32xf32>
    %cst_88 = arith.constant dense<0.000000e+00> : vector<8x128xf32>
    %270 = tpu.matmul %269, %3, %cst_88 {dimension_numbers = #tpu.dot_dimension_numbers<[1], [0], [0], [1], [0, 0, 1, 1], [], []>} : vector<8x32xf32>, vector<32x128xf32>, vector<8x128xf32> -> vector<8x128xf32>
    %cst_89 = arith.constant dense<0.000000e+00> : vector<8x128xf32>
    %271 = tpu.matmul %245, %7, %cst_89 {dimension_numbers = #tpu.dot_dimension_numbers<[1], [0], [0], [1], [0, 0, 1, 1], [], []>} : vector<8x32xf32>, vector<32x128xf32>, vector<8x128xf32> -> vector<8x128xf32>
    %272 = arith.addf %270, %271 : vector<8x128xf32>
    %273 = vector.broadcast %11 : vector<1x128xf32> to vector<8x128xf32>
    %274 = arith.addf %272, %273 : vector<8x128xf32>
    %cst_90 = arith.constant 5.000000e-01 : f32
    %275 = vector.broadcast %cst_90 : f32 to vector<8x128xf32>
    %276 = arith.mulf %275, %274 : vector<8x128xf32>
    %277 = math.tanh %276 : vector<8x128xf32>
    %cst_91 = arith.constant 5.000000e-01 : f32
    %278 = vector.broadcast %cst_91 : f32 to vector<8x128xf32>
    %279 = arith.mulf %278, %277 : vector<8x128xf32>
    %cst_92 = arith.constant 5.000000e-01 : f32
    %280 = vector.broadcast %cst_92 : f32 to vector<8x128xf32>
    %281 = arith.addf %279, %280 : vector<8x128xf32>
    %282 = math.tanh %274 : vector<8x128xf32>
    %283 = vector.extract_strided_slice %281 {offsets = [0, 0], sizes = [8, 32], strides = [1, 1]} : vector<8x128xf32> to vector<8x32xf32>
    %284 = vector.extract_strided_slice %281 {offsets = [0, 32], sizes = [8, 32], strides = [1, 1]} : vector<8x128xf32> to vector<8x32xf32>
    %285 = vector.extract_strided_slice %282 {offsets = [0, 64], sizes = [8, 32], strides = [1, 1]} : vector<8x128xf32> to vector<8x32xf32>
    %286 = vector.extract_strided_slice %281 {offsets = [0, 96], sizes = [8, 32], strides = [1, 1]} : vector<8x128xf32> to vector<8x32xf32>
    %287 = arith.mulf %284, %243 : vector<8x32xf32>
    %288 = arith.mulf %283, %285 : vector<8x32xf32>
    %289 = arith.addf %287, %288 : vector<8x32xf32>
    %290 = math.tanh %289 : vector<8x32xf32>
    %291 = arith.mulf %286, %290 : vector<8x32xf32>
    %c6 = arith.constant 6 : index
    %c0_93 = arith.constant 0 : index
    %c0_94 = arith.constant 0 : index
    %292 = vector.load %arg0[%c6, %c0_93, %c0_94] : memref<7x8x32xf32, #tpu.memory_space<vmem>>, vector<1x8x32xf32>
    %293 = vector.shape_cast %292 : vector<1x8x32xf32> to vector<8x32xf32>
    %cst_95 = arith.constant dense<0.000000e+00> : vector<8x128xf32>
    %294 = tpu.matmul %293, %1, %cst_95 {dimension_numbers = #tpu.dot_dimension_numbers<[1], [0], [0], [1], [0, 0, 1, 1], [], []>} : vector<8x32xf32>, vector<32x128xf32>, vector<8x128xf32> -> vector<8x128xf32>
    %cst_96 = arith.constant dense<0.000000e+00> : vector<8x128xf32>
    %295 = tpu.matmul %269, %5, %cst_96 {dimension_numbers = #tpu.dot_dimension_numbers<[1], [0], [0], [1], [0, 0, 1, 1], [], []>} : vector<8x32xf32>, vector<32x128xf32>, vector<8x128xf32> -> vector<8x128xf32>
    %296 = arith.addf %294, %295 : vector<8x128xf32>
    %297 = vector.broadcast %9 : vector<1x128xf32> to vector<8x128xf32>
    %298 = arith.addf %296, %297 : vector<8x128xf32>
    %cst_97 = arith.constant 5.000000e-01 : f32
    %299 = vector.broadcast %cst_97 : f32 to vector<8x128xf32>
    %300 = arith.mulf %299, %298 : vector<8x128xf32>
    %301 = math.tanh %300 : vector<8x128xf32>
    %cst_98 = arith.constant 5.000000e-01 : f32
    %302 = vector.broadcast %cst_98 : f32 to vector<8x128xf32>
    %303 = arith.mulf %302, %301 : vector<8x128xf32>
    %cst_99 = arith.constant 5.000000e-01 : f32
    %304 = vector.broadcast %cst_99 : f32 to vector<8x128xf32>
    %305 = arith.addf %303, %304 : vector<8x128xf32>
    %306 = math.tanh %298 : vector<8x128xf32>
    %307 = vector.extract_strided_slice %305 {offsets = [0, 0], sizes = [8, 32], strides = [1, 1]} : vector<8x128xf32> to vector<8x32xf32>
    %308 = vector.extract_strided_slice %305 {offsets = [0, 32], sizes = [8, 32], strides = [1, 1]} : vector<8x128xf32> to vector<8x32xf32>
    %309 = vector.extract_strided_slice %306 {offsets = [0, 64], sizes = [8, 32], strides = [1, 1]} : vector<8x128xf32> to vector<8x32xf32>
    %310 = vector.extract_strided_slice %305 {offsets = [0, 96], sizes = [8, 32], strides = [1, 1]} : vector<8x128xf32> to vector<8x32xf32>
    %311 = arith.mulf %308, %267 : vector<8x32xf32>
    %312 = arith.mulf %307, %309 : vector<8x32xf32>
    %313 = arith.addf %311, %312 : vector<8x32xf32>
    %314 = math.tanh %313 : vector<8x32xf32>
    %315 = arith.mulf %310, %314 : vector<8x32xf32>
    %cst_100 = arith.constant dense<0.000000e+00> : vector<8x128xf32>
    %316 = tpu.matmul %315, %3, %cst_100 {dimension_numbers = #tpu.dot_dimension_numbers<[1], [0], [0], [1], [0, 0, 1, 1], [], []>} : vector<8x32xf32>, vector<32x128xf32>, vector<8x128xf32> -> vector<8x128xf32>
    %cst_101 = arith.constant dense<0.000000e+00> : vector<8x128xf32>
    %317 = tpu.matmul %291, %7, %cst_101 {dimension_numbers = #tpu.dot_dimension_numbers<[1], [0], [0], [1], [0, 0, 1, 1], [], []>} : vector<8x32xf32>, vector<32x128xf32>, vector<8x128xf32> -> vector<8x128xf32>
    %318 = arith.addf %316, %317 : vector<8x128xf32>
    %319 = vector.broadcast %11 : vector<1x128xf32> to vector<8x128xf32>
    %320 = arith.addf %318, %319 : vector<8x128xf32>
    %cst_102 = arith.constant 5.000000e-01 : f32
    %321 = vector.broadcast %cst_102 : f32 to vector<8x128xf32>
    %322 = arith.mulf %321, %320 : vector<8x128xf32>
    %323 = math.tanh %322 : vector<8x128xf32>
    %cst_103 = arith.constant 5.000000e-01 : f32
    %324 = vector.broadcast %cst_103 : f32 to vector<8x128xf32>
    %325 = arith.mulf %324, %323 : vector<8x128xf32>
    %cst_104 = arith.constant 5.000000e-01 : f32
    %326 = vector.broadcast %cst_104 : f32 to vector<8x128xf32>
    %327 = arith.addf %325, %326 : vector<8x128xf32>
    %328 = math.tanh %320 : vector<8x128xf32>
    %329 = vector.extract_strided_slice %327 {offsets = [0, 0], sizes = [8, 32], strides = [1, 1]} : vector<8x128xf32> to vector<8x32xf32>
    %330 = vector.extract_strided_slice %327 {offsets = [0, 32], sizes = [8, 32], strides = [1, 1]} : vector<8x128xf32> to vector<8x32xf32>
    %331 = vector.extract_strided_slice %328 {offsets = [0, 64], sizes = [8, 32], strides = [1, 1]} : vector<8x128xf32> to vector<8x32xf32>
    %332 = vector.extract_strided_slice %327 {offsets = [0, 96], sizes = [8, 32], strides = [1, 1]} : vector<8x128xf32> to vector<8x32xf32>
    %333 = arith.mulf %330, %289 : vector<8x32xf32>
    %334 = arith.mulf %329, %331 : vector<8x32xf32>
    %335 = arith.addf %333, %334 : vector<8x32xf32>
    %336 = math.tanh %335 : vector<8x32xf32>
    %337 = arith.mulf %332, %336 : vector<8x32xf32>
    %c0_105 = arith.constant 0 : index
    %c0_106 = arith.constant 0 : index
    %c0_107 = arith.constant 0 : index
    %338 = vector.load %arg4[%c0_105, %c0_106, %c0_107] : memref<2x8x32xf32, #tpu.memory_space<vmem>>, vector<1x8x32xf32>
    %339 = vector.shape_cast %338 : vector<1x8x32xf32> to vector<8x32xf32>
    %340 = vector.shape_cast %315 : vector<8x32xf32> to vector<1x8x32xf32>
    tpu.vector_store %arg4[%c0_105, %c0_106, %c0_107], %340 {strides = array<i32>} : memref<2x8x32xf32, #tpu.memory_space<vmem>>, vector<1x8x32xf32>,
    %c0_108 = arith.constant 0 : index
    %c0_109 = arith.constant 0 : index
    %c0_110 = arith.constant 0 : index
    %341 = vector.load %arg5[%c0_108, %c0_109, %c0_110] : memref<2x8x32xf32, #tpu.memory_space<vmem>>, vector<1x8x32xf32>
    %342 = vector.shape_cast %341 : vector<1x8x32xf32> to vector<8x32xf32>
    %343 = vector.shape_cast %313 : vector<8x32xf32> to vector<1x8x32xf32>
    tpu.vector_store %arg5[%c0_108, %c0_109, %c0_110], %343 {strides = array<i32>} : memref<2x8x32xf32, #tpu.memory_space<vmem>>, vector<1x8x32xf32>,
    %c1_111 = arith.constant 1 : index
    %c0_112 = arith.constant 0 : index
    %c0_113 = arith.constant 0 : index
    %344 = vector.load %arg4[%c1_111, %c0_112, %c0_113] : memref<2x8x32xf32, #tpu.memory_space<vmem>>, vector<1x8x32xf32>
    %345 = vector.shape_cast %344 : vector<1x8x32xf32> to vector<8x32xf32>
    %346 = vector.shape_cast %337 : vector<8x32xf32> to vector<1x8x32xf32>
    tpu.vector_store %arg4[%c1_111, %c0_112, %c0_113], %346 {strides = array<i32>} : memref<2x8x32xf32, #tpu.memory_space<vmem>>, vector<1x8x32xf32>,
    %c1_114 = arith.constant 1 : index
    %c0_115 = arith.constant 0 : index
    %c0_116 = arith.constant 0 : index
    %347 = vector.load %arg5[%c1_114, %c0_115, %c0_116] : memref<2x8x32xf32, #tpu.memory_space<vmem>>, vector<1x8x32xf32>
    %348 = vector.shape_cast %347 : vector<1x8x32xf32> to vector<8x32xf32>
    %349 = vector.shape_cast %335 : vector<8x32xf32> to vector<1x8x32xf32>
    tpu.vector_store %arg5[%c1_114, %c0_115, %c0_116], %349 {strides = array<i32>} : memref<2x8x32xf32, #tpu.memory_space<vmem>>, vector<1x8x32xf32>,
    return
  }
}

</mosaic_0001>

<bundles_post_ra>
// kernel: encoder_forward.1
= control target key start
LH: loop header
LB: loop body
LE: loop exit
PB: predicated region body
PF: predicated region fallthrough
CT: control target
= control target key end

     0   :  { %vm41_vm0 = vcmask 261120   ;;  %v1191_v9 = vmov 0.0   ;;  %s1192_s13 = smov 64   ;;  %s1193_s14 = smov 32   ;;  %s1588_s2 = inlined_call_operand.vmem [shape: f32[2,32,128], index: 2, kind: input, shape index: {}]   ;;  %s1589_s1 = inlined_call_operand.vmem [shape: f32[2,32,128], index: 1, kind: input, shape index: {}]   ;;  %s1590_s0 = inlined_call_operand.vmem [shape: f32[7,8,32], index: 0, kind: input, shape index: {}]   ;;  %s1591_s3 = inlined_call_operand.vmem [shape: f32[2,1,128], index: 3, kind: input, shape index: {}]   ;;  %s1592_s4 = inlined_call_operand.vmem [shape: f32[2,8,32], index: 4, kind: output, shape index: {0}]   ;;  %s1593_s5 = inlined_call_operand.vmem [shape: f32[2,8,32], index: 5, kind: output, shape index: {1}]  }
   0x1   :  { %v1228_v0 = vld [vmem:[%s1588_s2 + $0x18] sm:$0xff]  ;;  %v1238_v2 = vld [vmem:[%s1588_s2 + $0x10] sm:$0xff]  ;;  %v1250_v4 = vld [vmem:[%s1588_s2 + $0x8] sm:$0xff]  ;;  %s1194_s20 = smov 96  }
   0x2   :  { %v1233_v1 = vld [vmem:[%s1589_s1 + $0x18] sm:$0xff]  ;;  %57 = vmatpush.msra.mxu0 %v1228_v0  ;;  %v1245_v3 = vld [vmem:[%s1589_s1 + $0x10] sm:$0xff]  ;;  %v1255_v5 = vld [vmem:[%s1589_s1 + $0x8] sm:$0xff] }
   0x3   :  { %80 = vmatpush.msra.mxu1 %v1233_v1  ;;  %v1262_v6 = vld [vmem:[%s1588_s2] sm:$0xff]  ;;  %v1308_v26 = vld [vmem:[%s1588_s2 + $0x38] sm:$0xff]  ;;  %v1318_v28 = vld [vmem:[%s1588_s2 + $0x30] sm:$0xff] }
   0x4   :  { %58 = vmatpush.msra.mxu0 %v1238_v2  ;;  %v1267_v7 = vld [vmem:[%s1589_s1] sm:$0xff]  ;;  %v1313_v27 = vld [vmem:[%s1589_s1 + $0x38] sm:$0xff]  ;;  %126 = vmatpush.msra.mxu2 %v1308_v26  ;;  %v1325_v29 = vld [vmem:[%s1589_s1 + $0x30] sm:$0xff] }
   0x5   :  { %81 = vmatpush.msra.mxu1 %v1245_v3  ;;  %v40_v8 = vld [vmem:[%s1590_s0] sm:$0xff]  ;;  %151 = vmatpush.msra.mxu3 %v1313_v27  ;;  %v1330_v30 = vld [vmem:[%s1588_s2 + $0x28] sm:$0xff] }
   0x6   :  { %59 = vmatpush.msra.mxu0 %v1250_v4  ;;  %v1296_v10 = vld [vmem:[%s1591_s3] ss:$0 sm:$0xff]  ;;  %v1335_v31 = vld [vmem:[%s1589_s1 + $0x28] sm:$0xff]  ;;  %127 = vmatpush.msra.mxu2 %v1318_v28  ;;  %v1387_v39 = vld [vmem:[%s1591_s3 + $0x1] ss:$0 sm:$0xff] }
   0x7   :  { %82 = vmatpush.msra.mxu1 %v1255_v5  ;;  %152 = vmatpush.msra.mxu3 %v1325_v29  ;;  %v1342_v32 = vld [vmem:[%s1588_s2 + $0x20] sm:$0xff]  ;;  %v1069_v36 = vld [vmem:[%s1590_s0 + $0x8] sm:$0xff] }
   0x8   :  { %60 = vmatpush.msra.mxu0 %v1262_v6  ;;  %v1347_v33 = vld [vmem:[%s1589_s1 + $0x20] sm:$0xff]  ;;  %128 = vmatpush.msra.mxu2 %v1330_v30 }
   0x9   :  { %83 = vmatpush.msra.mxu1 %v1267_v7  ;;  %61 = vmatmul.f32.vlgmr.msra.gmra.mxu0 %v1191_v9 }
   0xa   :  { %1067 = vmatmul.msk.f32.vlgmr.msra.gmra.mxu1 %vm41_vm0, %v40_v8  ;;  %199 = vmatpush.msrb.mxu0 %v1228_v0 }
   0xb   :  { %222 = vmatpush.msrb.mxu1 %v1233_v1  ;;  %153 = vmatpush.msra.mxu3 %v1335_v31 }
   0xc   :  { %200 = vmatpush.msrb.mxu0 %v1238_v2  ;;  %129 = vmatpush.msra.mxu2 %v1342_v32 }
   0xd   :  { %223 = vmatpush.msrb.mxu1 %v1245_v3  ;;  %154 = vmatpush.msra.mxu3 %v1347_v33 }
   0xe   :  { %201 = vmatpush.msrb.mxu0 %v1250_v4  ;;  %130 = vmatmul.f32.vlgmr.msra.gmra.mxu2 %v1191_v9 }
   0xf   :  { %224 = vmatpush.msrb.mxu1 %v1255_v5  ;;  %295 = vmatpush.msrb.mxu3 %v1313_v27 }
  0x10   :  { %202 = vmatpush.msrb.mxu0 %v1262_v6  ;;  %270 = vmatpush.msrb.mxu2 %v1308_v26 }
  0x11   :  { %225 = vmatpush.msrb.mxu1 %v1267_v7  ;;  %296 = vmatpush.msrb.mxu3 %v1325_v29 }
  0x12   :  { %340 = vmatpush.msra.mxu0 %v1228_v0  ;;  %271 = vmatpush.msrb.mxu2 %v1318_v28 }
  0x13   :  { %363 = vmatpush.msra.mxu1 %v1233_v1  ;;  %297 = vmatpush.msrb.mxu3 %v1335_v31 }
  0x14   :  { %341 = vmatpush.msra.mxu0 %v1238_v2  ;;  %272 = vmatpush.msrb.mxu2 %v1330_v30 }
  0x15   :  { %364 = vmatpush.msra.mxu1 %v1245_v3  ;;  %298 = vmatpush.msrb.mxu3 %v1347_v33 }
  0x16   :  { %342 = vmatpush.msra.mxu0 %v1250_v4  ;;  %273 = vmatpush.msrb.mxu2 %v1342_v32 }
  0x17   :  { %365 = vmatpush.msra.mxu1 %v1255_v5 }
  0x18   :  { %343 = vmatpush.msra.mxu0 %v1262_v6  ;;  %411 = vmatpush.msra.mxu2 %v1308_v26 }
  0x19   :  { %366 = vmatpush.msra.mxu1 %v1267_v7 }
  0x1a   :  { %412 = vmatpush.msra.mxu2 %v1318_v28  ;;  %1071 = vmatmul.msk.f32.vlgmr.msrb.gmra.mxu1 %vm41_vm0, %v1069_v36 }
  0x1b   :  { %504 = vmatpush.msrb.mxu1 %v1233_v1 }
  0x1c   :  { %413 = vmatpush.msra.mxu2 %v1330_v30 }
  0x1d   :  { %505 = vmatpush.msrb.mxu1 %v1245_v3 }
  0x1e   :  { %414 = vmatpush.msra.mxu2 %v1342_v32 }
  0x1f   :  { %506 = vmatpush.msrb.mxu1 %v1255_v5 }
  0x21   :  { %507 = vmatpush.msrb.mxu1 %v1267_v7 }
  0x86   :  { %v62_v11 = vpop.f32.mrf.mxu0 }
  0x87   :  { %v85_v12 = vpop.f32.mrf.mxu1 }
  0x88   :  { %v86_v13 = vadd.f32 %v85_v12, %v62_v11 }
  0x8a   :  { %v91_v14 = vadd.f32 %v1296_v10, %v86_v13 }
  0x8c   :  { %1107 = vtanh.f32 %v91_v14  ;;  %v92_v16 = vmul.f32 0.5, %v91_v14 }
  0x8e   :  { %1109 = vtanh.f32 %v92_v16 }
  0x91   :  { %v131_v38 = vpop.f32.mrf.mxu2 }
  0x92   :  { %v1108_v15 = vpop.eup %1107 }
  0x93   :  { %99 = vrot.lane.b32.xlu0 %v1108_v15, %s1192_s13 }
  0x94   :  { %v1110_v17 = vpop.eup %1109 }
  0x95   :  { %v94_v18 = vmul.f32 0.5, %v1110_v17 }
  0x97   :  { %v95_v19 = vadd.f32 0.5, %v94_v18  ;;  %v227_v43 = vpop.f32.mrf.mxu1  ;;  %v1074_v18 = vld [vmem:[%s1590_s0 + $0x10] sm:$0xff] }
  0x98   :  { %1076 = vmatmul.msk.f32.vlgmr.msra.gmra.mxu1 %vm41_vm0, %v1074_v18 }
  0x99   :  { %v97_v22 = vmul.f32 0.0, %v95_v19  ;;  %645 = vmatpush.msra.mxu1 %v1233_v1 }
  0x9b   :  { %646 = vmatpush.msra.mxu1 %v1245_v3 }
  0x9d   :  { %647 = vmatpush.msra.mxu1 %v1255_v5 }
  0x9f   :  { %648 = vmatpush.msra.mxu1 %v1267_v7 }
 0x105   :  { %v100_v20 = vpop.permute.xlu0 %99 }
 0x106   :  { %v102_v21 = vmul.f32 %v100_v20, %v95_v19 }
 0x108   :  { %104 = vrot.lane.b32.xlu0 %v102_v21, %s1193_s14 }
 0x115   :  { %v368_v21 = vpop.f32.mrf.mxu1 }
 0x17a   :  { %v105_v23 = vpop.permute.xlu0 %104 }
 0x17b   :  { %v1301_v24 = vadd.f32 %v105_v23, %v97_v22 }
 0x17d   :  { %1111 = vtanh.f32 %v1301_v24 }
 0x183   :  { %v1112_v25 = vpop.eup %1111 }
 0x184   :  { %110 = vrot.lane.b32.xlu1 %v1112_v25, %s1192_s13 }
 0x1f6   :  { %v111_v34 = vpop.permute.xlu1 %110 }
 0x1f7   :  { %v113_v35 = vmul.f32 %v111_v34, %v95_v19 }
 0x1f9   :  { %135 = vrot.lane.b32.xlu1 %v113_v35, %s1193_s14 }
 0x26b   :  { %v136_v37 = vpop.permute.xlu1 %135 }
 0x26c   :  { %1068 = vmatmul.msk.f32.vlgmr.msra.gmra.mxu3 %vm41_vm0, %v136_v37  ;;  %1070 = vmatmul.msk.f32.vlgmr.msrb.gmra.mxu0 %vm41_vm0, %v136_v37 }
 0x26d   :  { %481 = vmatpush.msrb.mxu0 %v1228_v0  ;;  %436 = vmatpush.msra.mxu3 %v1313_v27 }
 0x26f   :  { %482 = vmatpush.msrb.mxu0 %v1238_v2  ;;  %437 = vmatpush.msra.mxu3 %v1325_v29 }
 0x271   :  { %483 = vmatpush.msrb.mxu0 %v1250_v4  ;;  %438 = vmatpush.msra.mxu3 %v1335_v31 }
 0x273   :  { %484 = vmatpush.msrb.mxu0 %v1262_v6  ;;  %439 = vmatpush.msra.mxu3 %v1347_v33 }
 0x2e9   :  { %v204_v42 = vpop.f32.mrf.mxu0 }
 0x2ea   :  { %v228_v45 = vadd.f32 %v227_v43, %v204_v42 }
 0x2ec   :  { %v230_v46 = vadd.f32 %v1296_v10, %v228_v45 }
 0x2ee   :  { %v231_v50 = vmul.f32 0.5, %v230_v46 }
 0x2ef   :  { %v156_v40 = vpop.f32.mrf.mxu3 }
 0x2f0   :  { %v157_v41 = vadd.f32 %v156_v40, %v131_v38 }
 0x2f2   :  { %v162_v44 = vadd.f32 %v1387_v39, %v157_v41 }
 0x2f4   :  { %1113 = vtanh.f32 %v162_v44  ;;  %v163_v49 = vmul.f32 0.5, %v162_v44 }
 0x2f5   :  { %1115 = vtanh.f32 %v230_v46 }
 0x2f6   :  { %1117 = vtanh.f32 %v163_v49 }
 0x2f7   :  { %1119 = vtanh.f32 %v231_v50 }
 0x2fa   :  { %v1114_v47 = vpop.eup %1113 }
 0x2fb   :  { %170 = vrot.lane.b32.xlu2 %v1114_v47, %s1192_s13  ;;  %v1116_v48 = vpop.eup %1115 }
 0x2fc   :  { %v1118_v51 = vpop.eup %1117 }
 0x2fd   :  { %v165_v52 = vmul.f32 0.5, %v1118_v51  ;;  %v1120_v54 = vpop.eup %1119 }
 0x2fe   :  { %v233_v57 = vmul.f32 0.5, %v1120_v54 }
 0x2ff   :  { %v166_v53 = vadd.f32 0.5, %v165_v52 }
 0x300   :  { %v234_v58 = vadd.f32 0.5, %v233_v57 }
 0x301   :  { %v168_v61 = vmul.f32 0.0, %v166_v53 }
 0x302   :  { %v236_v8 = vmul.f32 %v234_v58, %v1301_v24 }
 0x303   :  { %238 = vrot.lane.b32.xlu2 %v1116_v48, %s1192_s13 }
 0x355   :  { %v171_v55 = vpop.permute.xlu2 %170 }
 0x356   :  { %v173_v56 = vmul.f32 %v171_v55, %v166_v53 }
 0x358   :  { %175 = vrot.lane.b32.xlu0 %v173_v56, %s1193_s14 }
 0x35d   :  { %v239_v59 = vpop.permute.xlu2 %238 }
 0x35e   :  { %v241_v60 = vmul.f32 %v239_v59, %v234_v58 }
 0x360   :  { %243 = vrot.lane.b32.xlu1 %v241_v60, %s1193_s14 }
 0x3ca   :  { %v176_v62 = vpop.permute.xlu0 %175 }
 0x3cb   :  { %v1395_v63 = vadd.f32 %v176_v62, %v168_v61 }
 0x3cd   :  { %1121 = vtanh.f32 %v1395_v63 }
 0x3d2   :  { %v244_v9 = vpop.permute.xlu1 %243 }
 0x3d3   :  { %v1122_v11 = vpop.eup %1121  ;;  %v1399_v12 = vadd.f32 %v244_v9, %v236_v8  ;;  %v1079_v8 = vld [vmem:[%s1590_s0 + $0x18] sm:$0xff] }
 0x3d4   :  { %181 = vrot.lane.b32.xlu2 %v1122_v11, %s1192_s13  ;;  %1081 = vmatmul.msk.f32.vlgmr.msrb.gmra.mxu1 %vm41_vm0, %v1079_v8 }
 0x3d5   :  { %1123 = vtanh.f32 %v1399_v12  ;;  %786 = vmatpush.msrb.mxu1 %v1233_v1 }
 0x3d7   :  { %787 = vmatpush.msrb.mxu1 %v1245_v3 }
 0x3d9   :  { %788 = vmatpush.msrb.mxu1 %v1255_v5 }
 0x3db   :  { %v1124_v13 = vpop.eup %1123  ;;  %789 = vmatpush.msrb.mxu1 %v1267_v7 }
 0x3dc   :  { %249 = vrot.lane.b32.xlu0 %v1124_v13, %s1192_s13 }
 0x42e   :  { %v182_v14 = vpop.permute.xlu2 %181 }
 0x42f   :  { %v184_v15 = vmul.f32 %v182_v14, %v166_v53 }
 0x431   :  { %254 = vrot.lane.b32.xlu1 %v184_v15, %s1193_s14 }
 0x44e   :  { %v250_v16 = vpop.permute.xlu0 %249 }
 0x44f   :  { %v252_v17 = vmul.f32 %v250_v16, %v234_v58 }
 0x451   :  { %279 = vrot.lane.b32.xlu2 %v252_v17, %s1193_s14 }
 0x4a3   :  { %v255_v19 = vpop.permute.xlu1 %254 }
 0x4a4   :  { %1072 = vmatmul.msk.f32.vlgmr.msrb.gmra.mxu2 %vm41_vm0, %v255_v19 }
 0x4a5   :  { %552 = vmatpush.msrb.mxu2 %v1308_v26 }
 0x4a7   :  { %553 = vmatpush.msrb.mxu2 %v1318_v28 }
 0x4a9   :  { %554 = vmatpush.msrb.mxu2 %v1330_v30 }
 0x4ab   :  { %v280_v20 = vpop.permute.xlu2 %279  ;;  %555 = vmatpush.msrb.mxu2 %v1342_v32 }
 0x4ac   :  { %1073 = vmatmul.msk.f32.vlgmr.msrb.gmra.mxu3 %vm41_vm0, %v280_v20  ;;  %1075 = vmatmul.msk.f32.vlgmr.msra.gmra.mxu0 %vm41_vm0, %v280_v20 }
 0x4ad   :  { %577 = vmatpush.msrb.mxu3 %v1313_v27  ;;  %622 = vmatpush.msra.mxu0 %v1228_v0 }
 0x4af   :  { %578 = vmatpush.msrb.mxu3 %v1325_v29  ;;  %623 = vmatpush.msra.mxu0 %v1238_v2 }
 0x4b1   :  { %579 = vmatpush.msrb.mxu3 %v1335_v31  ;;  %624 = vmatpush.msra.mxu0 %v1250_v4 }
 0x4b3   :  { %580 = vmatpush.msrb.mxu3 %v1347_v33  ;;  %625 = vmatpush.msra.mxu0 %v1262_v6 }
 0x527   :  { %v275_v25 = vpop.f32.mrf.mxu2 }
 0x529   :  { %v345_v22 = vpop.f32.mrf.mxu0 }
 0x52a   :  { %v369_v23 = vadd.f32 %v368_v21, %v345_v22 }
 0x52c   :  { %v371_v24 = vadd.f32 %v1296_v10, %v369_v23 }
 0x52e   :  { %1125 = vtanh.f32 %v371_v24  ;;  %v372_v40 = vmul.f32 0.5, %v371_v24 }
 0x52f   :  { %v300_v34 = vpop.f32.mrf.mxu3 }
 0x530   :  { %v301_v35 = vadd.f32 %v300_v34, %v275_v25 }
 0x532   :  { %v303_v36 = vadd.f32 %v1387_v39, %v301_v35 }
 0x534   :  { %v1126_v37 = vpop.eup %1125  ;;  %1127 = vtanh.f32 %v303_v36  ;;  %v304_v41 = vmul.f32 0.5, %v303_v36 }
 0x535   :  { %379 = vrot.lane.b32.xlu1 %v1126_v37, %s1192_s13  ;;  %1129 = vtanh.f32 %v372_v40 }
 0x536   :  { %1131 = vtanh.f32 %v304_v41 }
 0x53a   :  { %v1128_v38 = vpop.eup %1127 }
 0x53b   :  { %311 = vrot.lane.b32.xlu0 %v1128_v38, %s1192_s13  ;;  %v1130_v42 = vpop.eup %1129 }
 0x53c   :  { %v374_v43 = vmul.f32 0.5, %v1130_v42  ;;  %v1132_v44 = vpop.eup %1131 }
 0x53d   :  { %v306_v48 = vmul.f32 0.5, %v1132_v44 }
 0x53e   :  { %v375_v45 = vadd.f32 0.5, %v374_v43 }
 0x53f   :  { %v307_v49 = vadd.f32 0.5, %v306_v48 }
 0x540   :  { %v377_v56 = vmul.f32 %v375_v45, %v1399_v12  ;;  %v509_v12 = vpop.f32.mrf.mxu1 }
 0x541   :  { %v309_v52 = vmul.f32 %v307_v49, %v1395_v63 }
 0x5a7   :  { %v380_v46 = vpop.permute.xlu1 %379 }
 0x5a8   :  { %v382_v47 = vmul.f32 %v380_v46, %v375_v45 }
 0x5aa   :  { %384 = vrot.lane.b32.xlu0 %v382_v47, %s1193_s14 }
 0x5ad   :  { %v312_v50 = vpop.permute.xlu0 %311 }
 0x5ae   :  { %v314_v51 = vmul.f32 %v312_v50, %v307_v49 }
 0x5b0   :  { %316 = vrot.lane.b32.xlu2 %v314_v51, %s1193_s14 }
 0x60a   :  { %v317_v53 = vpop.permute.xlu2 %316 }
 0x60b   :  { %v1436_v54 = vadd.f32 %v317_v53, %v309_v52 }
 0x60d   :  { %1133 = vtanh.f32 %v1436_v54 }
 0x613   :  { %v1134_v55 = vpop.eup %1133 }
 0x614   :  { %322 = vrot.lane.b32.xlu1 %v1134_v55, %s1192_s13 }
 0x61c   :  { %v385_v57 = vpop.permute.xlu0 %384 }
 0x61d   :  { %v1441_v58 = vadd.f32 %v385_v57, %v377_v56 }
 0x61f   :  { %1135 = vtanh.f32 %v1441_v58 }
 0x625   :  { %v1136_v59 = vpop.eup %1135 }
 0x626   :  { %390 = vrot.lane.b32.xlu2 %v1136_v59, %s1192_s13 }
 0x680   :  { %v391_v60 = vpop.permute.xlu2 %390 }
 0x681   :  { %v393_v61 = vmul.f32 %v391_v60, %v375_v45 }
 0x683   :  { %420 = vrot.lane.b32.xlu1 %v393_v61, %s1193_s14 }
 0x686   :  { %v323_v62 = vpop.permute.xlu1 %322 }
 0x687   :  { %v325_v63 = vmul.f32 %v323_v62, %v307_v49 }
 0x689   :  { %395 = vrot.lane.b32.xlu0 %v325_v63, %s1193_s14 }
 0x6f5   :  { %v421_v9 = vpop.permute.xlu1 %420 }
 0x6f6   :  { %1078 = vmatmul.msk.f32.vlgmr.msra.gmra.mxu3 %vm41_vm0, %v421_v9  ;;  %1080 = vmatmul.msk.f32.vlgmr.msrb.gmra.mxu0 %vm41_vm0, %v421_v9 }
 0x6f7   :  { %718 = vmatpush.msra.mxu3 %v1313_v27  ;;  %763 = vmatpush.msrb.mxu0 %v1228_v0 }
 0x6f9   :  { %719 = vmatpush.msra.mxu3 %v1325_v29  ;;  %764 = vmatpush.msrb.mxu0 %v1238_v2 }
 0x6fb   :  { %v396_v11 = vpop.permute.xlu0 %395  ;;  %720 = vmatpush.msra.mxu3 %v1335_v31  ;;  %765 = vmatpush.msrb.mxu0 %v1250_v4 }
 0x6fc   :  { %1077 = vmatmul.msk.f32.vlgmr.msra.gmra.mxu2 %vm41_vm0, %v396_v11 }
 0x6fd   :  { %721 = vmatpush.msra.mxu3 %v1347_v33  ;;  %766 = vmatpush.msrb.mxu0 %v1262_v6 }
 0x6fe   :  { %693 = vmatpush.msra.mxu2 %v1308_v26 }
 0x700   :  { %694 = vmatpush.msra.mxu2 %v1318_v28 }
 0x702   :  { %695 = vmatpush.msra.mxu2 %v1330_v30 }
 0x704   :  { %696 = vmatpush.msra.mxu2 %v1342_v32 }
 0x773   :  { %v486_v13 = vpop.f32.mrf.mxu0 }
 0x774   :  { %v510_v14 = vadd.f32 %v509_v12, %v486_v13 }
 0x776   :  { %v512_v15 = vadd.f32 %v1296_v10, %v510_v14 }
 0x778   :  { %1137 = vtanh.f32 %v512_v15  ;;  %v513_v24 = vmul.f32 0.5, %v512_v15 }
 0x779   :  { %v441_v17 = vpop.f32.mrf.mxu3 }
 0x77e   :  { %v1138_v16 = vpop.eup %1137 }
 0x77f   :  { %v416_v18 = vpop.f32.mrf.mxu2  ;;  %520 = vrot.lane.b32.xlu0 %v1138_v16, %s1192_s13 }
 0x780   :  { %v442_v19 = vadd.f32 %v441_v17, %v416_v18 }
 0x782   :  { %v444_v20 = vadd.f32 %v1387_v39, %v442_v19 }
 0x784   :  { %1139 = vtanh.f32 %v444_v20  ;;  %v445_v22 = vmul.f32 0.5, %v444_v20 }
 0x786   :  { %1141 = vtanh.f32 %v445_v22 }
 0x787   :  { %1143 = vtanh.f32 %v513_v24 }
 0x78a   :  { %v1140_v21 = vpop.eup %1139 }
 0x78b   :  { %452 = vrot.lane.b32.xlu2 %v1140_v21, %s1192_s13 }
 0x78c   :  { %v1142_v23 = vpop.eup %1141 }
 0x78d   :  { %v447_v25 = vmul.f32 0.5, %v1142_v23  ;;  %v1144_v37 = vpop.eup %1143 }
 0x78e   :  { %v515_v38 = vmul.f32 0.5, %v1144_v37  ;;  %v1089_v37 = vld [vmem:[%s1590_s0 + $0x28] sm:$0xff] }
 0x78f   :  { %v448_v34 = vadd.f32 0.5, %v447_v25 }
 0x790   :  { %v516_v40 = vadd.f32 0.5, %v515_v38 }
 0x791   :  { %v450_v47 = vmul.f32 %v448_v34, %v1436_v54  ;;  %v1084_v54 = vld [vmem:[%s1590_s0 + $0x20] sm:$0xff] }
 0x792   :  { %v518_v43 = vmul.f32 %v516_v40, %v1441_v58  ;;  %1086 = vmatmul.msk.f32.vlgmr.msra.gmra.mxu1 %vm41_vm0, %v1084_v54 }
 0x793   :  { %927 = vmatpush.msra.mxu1 %v1233_v1 }
 0x795   :  { %928 = vmatpush.msra.mxu1 %v1245_v3 }
 0x797   :  { %929 = vmatpush.msra.mxu1 %v1255_v5 }
 0x799   :  { %930 = vmatpush.msra.mxu1 %v1267_v7 }
 0x79a   :  { %1091 = vmatmul.msk.f32.vlgmr.msrb.gmra.mxu1 %vm41_vm0, %v1089_v37 }
 0x7e5   :  { %v453_v35 = vpop.permute.xlu2 %452 }
 0x7e6   :  { %v455_v36 = vmul.f32 %v453_v35, %v448_v34 }
 0x7e8   :  { %457 = vrot.lane.b32.xlu1 %v455_v36, %s1193_s14 }
 0x7f1   :  { %v521_v41 = vpop.permute.xlu0 %520 }
 0x7f2   :  { %v523_v42 = vmul.f32 %v521_v41, %v516_v40 }
 0x7f4   :  { %525 = vrot.lane.b32.xlu2 %v523_v42, %s1193_s14 }
 0x80f   :  { %v650_v1 = vpop.f32.mrf.mxu1 }
 0x817   :  { %v791_v41 = vpop.f32.mrf.mxu1 }
 0x84e   :  { %v526_v44 = vpop.permute.xlu2 %525 }
 0x84f   :  { %v1477_v45 = vadd.f32 %v526_v44, %v518_v43 }
 0x851   :  { %1145 = vtanh.f32 %v1477_v45 }
 0x857   :  { %v1146_v46 = vpop.eup %1145 }
 0x858   :  { %531 = vrot.lane.b32.xlu1 %v1146_v46, %s1192_s13 }
 0x85a   :  { %v458_v48 = vpop.permute.xlu1 %457 }
 0x85b   :  { %v1482_v49 = vadd.f32 %v458_v48, %v450_v47 }
 0x85d   :  { %1147 = vtanh.f32 %v1482_v49 }
 0x863   :  { %v1148_v50 = vpop.eup %1147 }
 0x864   :  { %463 = vrot.lane.b32.xlu0 %v1148_v50, %s1192_s13 }
 0x8ca   :  { %v532_v51 = vpop.permute.xlu1 %531 }
 0x8cb   :  { %v534_v52 = vmul.f32 %v532_v51, %v516_v40 }
 0x8cd   :  { %561 = vrot.lane.b32.xlu0 %v534_v52, %s1193_s14 }
 0x8d6   :  { %v464_v53 = vpop.permute.xlu0 %463 }
 0x8d7   :  { %v466_v55 = vmul.f32 %v464_v53, %v448_v34 }
 0x8d9   :  { %536 = vrot.lane.b32.xlu2 %v466_v55, %s1193_s14 }
 0x933   :  { %v537_v56 = vpop.permute.xlu2 %536 }
 0x934   :  { %1082 = vmatmul.msk.f32.vlgmr.msrb.gmra.mxu2 %vm41_vm0, %v537_v56 }
 0x935   :  { %834 = vmatpush.msrb.mxu2 %v1308_v26 }
 0x937   :  { %835 = vmatpush.msrb.mxu2 %v1318_v28 }
 0x939   :  { %836 = vmatpush.msrb.mxu2 %v1330_v30 }
 0x93b   :  { %837 = vmatpush.msrb.mxu2 %v1342_v32 }
 0x93f   :  { %v562_v57 = vpop.permute.xlu0 %561 }
 0x940   :  { %1083 = vmatmul.msk.f32.vlgmr.msrb.gmra.mxu3 %vm41_vm0, %v562_v57  ;;  %1085 = vmatmul.msk.f32.vlgmr.msra.gmra.mxu0 %vm41_vm0, %v562_v57 }
 0x941   :  { %859 = vmatpush.msrb.mxu3 %v1313_v27  ;;  %904 = vmatpush.msra.mxu0 %v1228_v0 }
 0x943   :  { %860 = vmatpush.msrb.mxu3 %v1325_v29  ;;  %905 = vmatpush.msra.mxu0 %v1238_v2 }
 0x945   :  { %861 = vmatpush.msrb.mxu3 %v1335_v31  ;;  %906 = vmatpush.msra.mxu0 %v1250_v4 }
 0x947   :  { %862 = vmatpush.msrb.mxu3 %v1347_v33  ;;  %907 = vmatpush.msra.mxu0 %v1262_v6 }
 0x9b7   :  { %v557_v58 = vpop.f32.mrf.mxu2 }
 0x9bd   :  { %v627_v3 = vpop.f32.mrf.mxu0 }
 0x9be   :  { %v651_v5 = vadd.f32 %v650_v1, %v627_v3 }
 0x9c0   :  { %v653_v7 = vadd.f32 %v1296_v10, %v651_v5 }
 0x9c2   :  { %1149 = vtanh.f32 %v653_v7  ;;  %v654_v61 = vmul.f32 0.5, %v653_v7 }
 0x9c3   :  { %v582_v0 = vpop.f32.mrf.mxu3 }
 0x9c4   :  { %v583_v59 = vadd.f32 %v582_v0, %v557_v58 }
 0x9c6   :  { %v585_v60 = vadd.f32 %v1387_v39, %v583_v59 }
 0x9c8   :  { %v1150_v2 = vpop.eup %1149  ;;  %1151 = vtanh.f32 %v585_v60  ;;  %v586_v11 = vmul.f32 0.5, %v585_v60 }
 0x9c9   :  { %661 = vrot.lane.b32.xlu2 %v1150_v2, %s1192_s13  ;;  %1153 = vtanh.f32 %v654_v61 }
 0x9ca   :  { %1155 = vtanh.f32 %v586_v11 }
 0x9ce   :  { %v1152_v4 = vpop.eup %1151 }
 0x9cf   :  { %593 = vrot.lane.b32.xlu1 %v1152_v4, %s1192_s13  ;;  %v1154_v6 = vpop.eup %1153  ;;  %v1094_v4 = vld [vmem:[%s1590_s0 + $0x30] sm:$0xff] }
 0x9d0   :  { %v656_v62 = vmul.f32 0.5, %v1154_v6  ;;  %v1156_v12 = vpop.eup %1155  ;;  %1096 = vmatmul.msk.f32.vlgmr.msra.gmra.mxu1 %vm41_vm0, %v1094_v4 }
 0x9d1   :  { %v588_v13 = vmul.f32 0.5, %v1156_v12 }
 0x9d2   :  { %v657_v63 = vadd.f32 0.5, %v656_v62 }
 0x9d3   :  { %v589_v14 = vadd.f32 0.5, %v588_v13 }
 0x9d4   :  { %v659_v17 = vmul.f32 %v657_v63, %v1477_v45 }
 0x9d5   :  { %v591_v21 = vmul.f32 %v589_v14, %v1482_v49 }
 0xa23   :  { %v662_v8 = vpop.permute.xlu2 %661 }
 0xa24   :  { %v664_v9 = vmul.f32 %v662_v8, %v657_v63 }
 0xa26   :  { %666 = vrot.lane.b32.xlu1 %v664_v9, %s1193_s14 }
 0xa41   :  { %v594_v15 = vpop.permute.xlu1 %593 }
 0xa42   :  { %v596_v16 = vmul.f32 %v594_v15, %v589_v14 }
 0xa44   :  { %598 = vrot.lane.b32.xlu0 %v596_v16, %s1193_s14 }
 0xa4d   :  { %v932_v62 = vpop.f32.mrf.mxu1 }
 0xa98   :  { %v667_v18 = vpop.permute.xlu1 %666 }
 0xa99   :  { %v669_v19 = vadd.f32 %v667_v18, %v659_v17 }
 0xa9b   :  { %1157 = vtanh.f32 %v669_v19 }
 0xaa1   :  { %v1158_v20 = vpop.eup %1157 }
 0xaa2   :  { %672 = vrot.lane.b32.xlu0 %v1158_v20, %s1192_s13 }
 0xab6   :  { %v599_v22 = vpop.permute.xlu0 %598 }
 0xab7   :  { %v601_v23 = vadd.f32 %v599_v22, %v591_v21 }
 0xab9   :  { %1159 = vtanh.f32 %v601_v23 }
 0xabf   :  { %v1160_v24 = vpop.eup %1159 }
 0xac0   :  { %604 = vrot.lane.b32.xlu2 %v1160_v24, %s1192_s13 }
 0xb14   :  { %v673_v25 = vpop.permute.xlu0 %672 }
 0xb15   :  { %v675_v34 = vmul.f32 %v673_v25, %v657_v63 }
 0xb17   :  { %702 = vrot.lane.b32.xlu2 %v675_v34, %s1193_s14 }
 0xb1a   :  { %v605_v35 = vpop.permute.xlu2 %604 }
 0xb1b   :  { %v607_v36 = vmul.f32 %v605_v35, %v589_v14 }
 0xb1d   :  { %677 = vrot.lane.b32.xlu1 %v607_v36, %s1193_s14 }
 0xb71   :  { %v703_v38 = vpop.permute.xlu2 %702 }
 0xb72   :  { %1088 = vmatmul.msk.f32.vlgmr.msra.gmra.mxu3 %vm41_vm0, %v703_v38  ;;  %1090 = vmatmul.msk.f32.vlgmr.msrb.gmra.mxu0 %vm41_vm0, %v703_v38 }
 0xb73   :  { %1000 = vmatpush.msra.mxu3 %v1313_v27 }
 0xb75   :  { %1001 = vmatpush.msra.mxu3 %v1325_v29 }
 0xb77   :  { %1002 = vmatpush.msra.mxu3 %v1335_v31 }
 0xb79   :  { %1003 = vmatpush.msra.mxu3 %v1347_v33 }
 0xb8f   :  { %v678_v40 = vpop.permute.xlu1 %677 }
 0xb90   :  { %1087 = vmatmul.msk.f32.vlgmr.msra.gmra.mxu2 %vm41_vm0, %v678_v40 }
 0xb91   :  { %975 = vmatpush.msra.mxu2 %v1308_v26 }
 0xb93   :  { %976 = vmatpush.msra.mxu2 %v1318_v28 }
 0xb95   :  { %977 = vmatpush.msra.mxu2 %v1330_v30 }
 0xb97   :  { %978 = vmatpush.msra.mxu2 %v1342_v32 }
 0xbef   :  { %v768_v42 = vpop.f32.mrf.mxu0 }
 0xbf0   :  { %v792_v27 = vadd.f32 %v791_v41, %v768_v42 }
 0xbf2   :  { %v794_v29 = vadd.f32 %v1296_v10, %v792_v27 }
 0xbf4   :  { %1161 = vtanh.f32 %v794_v29  ;;  %v795_v30 = vmul.f32 0.5, %v794_v29 }
 0xbf5   :  { %v723_v33 = vpop.f32.mrf.mxu3 }
 0xbfa   :  { %v1162_v31 = vpop.eup %1161 }
 0xbfb   :  { %802 = vrot.lane.b32.xlu1 %v1162_v31, %s1192_s13 }
 0xc13   :  { %v698_v43 = vpop.f32.mrf.mxu2 }
 0xc14   :  { %v724_v44 = vadd.f32 %v723_v33, %v698_v43 }
 0xc16   :  { %v726_v26 = vadd.f32 %v1387_v39, %v724_v44 }
 0xc18   :  { %1163 = vtanh.f32 %v726_v26  ;;  %v727_v49 = vmul.f32 0.5, %v726_v26 }
 0xc19   :  { %1165 = vtanh.f32 %v795_v30 }
 0xc1a   :  { %1167 = vtanh.f32 %v727_v49 }
 0xc1e   :  { %v1164_v28 = vpop.eup %1163 }
 0xc1f   :  { %734 = vrot.lane.b32.xlu0 %v1164_v28, %s1192_s13  ;;  %v1166_v32 = vpop.eup %1165 }
 0xc20   :  { %v797_v45 = vmul.f32 0.5, %v1166_v32  ;;  %v1168_v50 = vpop.eup %1167 }
 0xc21   :  { %v729_v51 = vmul.f32 0.5, %v1168_v50 }
 0xc22   :  { %v798_v46 = vadd.f32 0.5, %v797_v45 }
 0xc23   :  { %v730_v52 = vadd.f32 0.5, %v729_v51 }
 0xc24   :  { %v800_v54 = vmul.f32 %v798_v46, %v669_v19 }
 0xc25   :  { %v732_v3 = vmul.f32 %v730_v52, %v601_v23 }
 0xc6d   :  { %v803_v47 = vpop.permute.xlu1 %802 }
 0xc6e   :  { %v805_v48 = vmul.f32 %v803_v47, %v798_v46 }
 0xc70   :  { %807 = vrot.lane.b32.xlu0 %v805_v48, %s1193_s14 }
 0xc91   :  { %v735_v53 = vpop.permute.xlu0 %734 }
 0xc92   :  { %v737_v55 = vmul.f32 %v735_v53, %v730_v52 }
 0xc94   :  { %739 = vrot.lane.b32.xlu2 %v737_v55, %s1193_s14 }
 0xce2   :  { %v808_v56 = vpop.permute.xlu0 %807 }
 0xce3   :  { %v810_v57 = vadd.f32 %v808_v56, %v800_v54 }
 0xce5   :  { %1169 = vtanh.f32 %v810_v57 }
 0xceb   :  { %v1170_v1 = vpop.eup %1169 }
 0xcec   :  { %813 = vrot.lane.b32.xlu2 %v1170_v1, %s1192_s13 }
 0xcee   :  { %v740_v5 = vpop.permute.xlu2 %739 }
 0xcef   :  { %v742_v7 = vadd.f32 %v740_v5, %v732_v3 }
 0xcf1   :  { %1171 = vtanh.f32 %v742_v7 }
 0xcf7   :  { %v1172_v58 = vpop.eup %1171 }
 0xcf8   :  { %745 = vrot.lane.b32.xlu1 %v1172_v58, %s1192_s13 }
 0xd46   :  { %v814_v0 = vpop.permute.xlu2 %813 }
 0xd47   :  { %v816_v59 = vmul.f32 %v814_v0, %v798_v46 }
 0xd49   :  { %843 = vrot.lane.b32.xlu1 %v816_v59, %s1193_s14 }
 0xd6a   :  { %v746_v60 = vpop.permute.xlu1 %745 }
 0xd6b   :  { %v748_v2 = vmul.f32 %v746_v60, %v730_v52 }
 0xd6d   :  { %818 = vrot.lane.b32.xlu0 %v748_v2, %s1193_s14 }
 0xdbb   :  { %v844_v61 = vpop.permute.xlu1 %843 }
 0xdbc   :  { %1093 = vmatmul.msk.f32.vlgmr.msrb.gmra.mxu3 %vm41_vm0, %v844_v61  ;;  %1095 = vmatmul.msk.f32.vlgmr.msra.gmra.mxu0 %vm41_vm0, %v844_v61 }
 0xddf   :  { %v819_v6 = vpop.permute.xlu0 %818 }
 0xde0   :  { %1092 = vmatmul.msk.f32.vlgmr.msrb.gmra.mxu2 %vm41_vm0, %v819_v6 }
 0xe39   :  { %v909_v63 = vpop.f32.mrf.mxu0 }
 0xe3a   :  { %v933_v8 = vadd.f32 %v932_v62, %v909_v63 }
 0xe3c   :  { %v935_v9 = vadd.f32 %v1296_v10, %v933_v8 }
 0xe3e   :  { %1173 = vtanh.f32 %v935_v9  ;;  %v936_v17 = vmul.f32 0.5, %v935_v9 }
 0xe3f   :  { %v864_v12 = vpop.f32.mrf.mxu3 }
 0xe44   :  { %v1174_v11 = vpop.eup %1173 }
 0xe45   :  { %943 = vrot.lane.b32.xlu0 %v1174_v11, %s1192_s13 }
 0xe63   :  { %v839_v13 = vpop.f32.mrf.mxu2 }
 0xe64   :  { %v865_v14 = vadd.f32 %v864_v12, %v839_v13 }
 0xe66   :  { %v867_v15 = vadd.f32 %v1387_v39, %v865_v14 }
 0xe68   :  { %1175 = vtanh.f32 %v867_v15  ;;  %v868_v21 = vmul.f32 0.5, %v867_v15 }
 0xe69   :  { %1177 = vtanh.f32 %v936_v17 }
 0xe6a   :  { %1179 = vtanh.f32 %v868_v21 }
 0xe6e   :  { %v1176_v16 = vpop.eup %1175 }
 0xe6f   :  { %875 = vrot.lane.b32.xlu2 %v1176_v16, %s1192_s13  ;;  %v1178_v18 = vpop.eup %1177 }
 0xe70   :  { %v938_v19 = vmul.f32 0.5, %v1178_v18  ;;  %v1180_v23 = vpop.eup %1179 }
 0xe71   :  { %v870_v24 = vmul.f32 0.5, %v1180_v23 }
 0xe72   :  { %v939_v20 = vadd.f32 0.5, %v938_v19 }
 0xe73   :  { %v871_v25 = vadd.f32 0.5, %v870_v24 }
 0xe74   :  { %v941_v36 = vmul.f32 %v939_v20, %v810_v57 }
 0xe75   :  { %v873_v41 = vmul.f32 %v871_v25, %v742_v7 }
 0xeb7   :  { %v944_v10 = vpop.permute.xlu0 %943 }
 0xeb8   :  { %v946_v22 = vmul.f32 %v944_v10, %v939_v20 }
 0xeba   :  { %948 = vrot.lane.b32.xlu2 %v946_v22, %s1193_s14 }
 0xec9   :  { %v876_v34 = vpop.permute.xlu2 %875 }
 0xeca   :  { %v878_v35 = vmul.f32 %v876_v34, %v871_v25 }
 0xecc   :  { %880 = vrot.lane.b32.xlu1 %v878_v35, %s1193_s14 }
 0xf14   :  { %v949_v37 = vpop.permute.xlu2 %948 }
 0xf15   :  { %v951_v38 = vadd.f32 %v949_v37, %v941_v36 }
 0xf17   :  { %1181 = vtanh.f32 %v951_v38 }
 0xf1d   :  { %v1182_v40 = vpop.eup %1181 }
 0xf1e   :  { %954 = vrot.lane.b32.xlu1 %v1182_v40, %s1192_s13 }
 0xf3e   :  { %v881_v42 = vpop.permute.xlu1 %880 }
 0xf3f   :  { %v883_v27 = vadd.f32 %v881_v42, %v873_v41 }
 0xf41   :  { %1183 = vtanh.f32 %v883_v27 }
 0xf47   :  { %v1184_v29 = vpop.eup %1183 }
 0xf48   :  { %886 = vrot.lane.b32.xlu0 %v1184_v29, %s1192_s13 }
 0xf90   :  { %v955_v31 = vpop.permute.xlu1 %954 }
 0xf91   :  { %v957_v33 = vmul.f32 %v955_v31, %v939_v20 }
 0xf93   :  { %984 = vrot.lane.b32.xlu0 %v957_v33, %s1193_s14 }
 0xfba   :  { %v887_v43 = vpop.permute.xlu0 %886 }
 0xfbb   :  { %v889_v44 = vmul.f32 %v887_v43, %v871_v25 }
 0xfbd   :  { %959 = vrot.lane.b32.xlu2 %v889_v44, %s1193_s14 }
0x1005   :  { %v985_v26 = vpop.permute.xlu0 %984 }
0x1006   :  { %1032 = vst.msk [vmem:[%s1592_s4] sm:$0xff] %vm41_vm0, %v985_v26  ;;  %1098 = vmatmul.msk.f32.vlgmr.msra.gmra.mxu3 %vm41_vm0, %v985_v26 }
0x1017   :  { %v960_v28 = vpop.permute.xlu2 %959 }
0x1018   :  { %1097 = vmatmul.msk.f32.vlgmr.msra.gmra.mxu2 %vm41_vm0, %v960_v28 }
0x1089   :  { %v1005_v30 = vpop.f32.mrf.mxu3 }
0x109b   :  { %v980_v32 = vpop.f32.mrf.mxu2 }
0x109c   :  { %v1006_v45 = vadd.f32 %v1005_v30, %v980_v32 }
0x109e   :  { %v1008_v46 = vadd.f32 %v1387_v39, %v1006_v45 }
0x10a0   :  { %1185 = vtanh.f32 %v1008_v46  ;;  %v1009_v48 = vmul.f32 0.5, %v1008_v46 }
0x10a2   :  { %1187 = vtanh.f32 %v1009_v48 }
0x10a6   :  { %v1186_v47 = vpop.eup %1185 }
0x10a7   :  { %1016 = vrot.lane.b32.xlu1 %v1186_v47, %s1192_s13 }
0x10a8   :  { %v1188_v49 = vpop.eup %1187 }
0x10a9   :  { %v1011_v50 = vmul.f32 0.5, %v1188_v49 }
0x10ab   :  { %v1012_v51 = vadd.f32 0.5, %v1011_v50 }
0x10ad   :  { %v1014_v39 = vmul.f32 %v1012_v51, %v883_v27 }
0x10af   :  { %1034 = vrot.lane.b32.xlu1 %v951_v38, %s1194_s20 }
0x1119   :  { %v1017_v52 = vpop.permute.xlu1 %1016 }
0x111a   :  { %v1019_v53 = vmul.f32 %v1017_v52, %v1012_v51 }
0x111c   :  { %1021 = vrot.lane.b32.xlu2 %v1019_v53, %s1193_s14 }
0x1121   :  { %v1035_v55 = vpop.permute.xlu1 %1034 }
0x1122   :  { %1037 = vst.msk [vmem:[%s1593_s5] sm:$0xff] %vm41_vm0, %v1035_v55 }
0x1176   :  { %v1022_v54 = vpop.permute.xlu2 %1021 }
0x1177   :  { %v1024_v56 = vadd.f32 %v1022_v54, %v1014_v39 }
0x1179   :  { %1189 = vtanh.f32 %v1024_v56 }
0x117f   :  { %v1190_v57 = vpop.eup %1189 }
0x1180   :  { %1027 = vrot.lane.b32.xlu0 %v1190_v57, %s1192_s13 }
0x1188   :  { %1045 = vrot.lane.b32.xlu0 %v1024_v56, %s1194_s20 }
0x11f2   :  { %v1028_v1 = vpop.permute.xlu0 %1027 }
0x11f3   :  { %v1030_v3 = vmul.f32 %v1028_v1, %v1012_v51 }
0x11f5   :  { %1039 = vrot.lane.b32.xlu2 %v1030_v3, %s1193_s14 }
0x11fa   :  { %v1046_v5 = vpop.permute.xlu0 %1045 }
0x11fb   :  { %1100 = vst.msk [vmem:[%s1593_s5 + $0x8] sm:$0xff] %vm41_vm0, %v1046_v5 }
0x124f   :  { %v1040_v7 = vpop.permute.xlu2 %1039 }
0x1250   :  { %1099 = vst.msk [vmem:[%s1592_s4 + $0x8] sm:$0xff] %vm41_vm0, %v1040_v7 }

</bundles_post_ra>
